<compile_context>
chip_gen: v5e
topology: v5e:2x2
jax: 0.10.0
libtpu: 0.0.40
codegen_flags: <defaults>
</compile_context>

<pallas_src>
import jax
import jax.numpy as jnp
from jax.experimental import pallas as pl
from jax.experimental.pallas import tpu as pltpu


def _encoder_seq_kernel(x_ref, h0_ref, w1x_ref, w1h_ref, b1_ref,
                        w2_ref, b2_ref, w3_ref, b3_ref,
                        out_ref, hN_ref, pre_ref):
    """Whole-rollout kernel.

    x_ref  : (T, input_size)  f32
    h0_ref : (1, HP)          f32   (HP = padded hidden size)
    w1x_ref: (input_size, HP); w1h_ref / w2_ref / w3_ref: (HP, HP)
    b*_ref : (1, HP)
    out_ref: (T, HP)  -- row t is the hidden state after step t
    hN_ref : (1, HP)  -- final hidden state (padded), for the recurrent carry
    pre_ref: (T, HP)  VMEM scratch -- hoisted input projection xs@W1x + b1
    """
    T = x_ref.shape[0]

    # Prologue: hoist the x-projection out of the recurrent chain.
    # One (T,in)x(in,HP) matmul instead of T separate (1,in)x(in,HP) matmuls.
    pre_ref[...] = (
        jnp.dot(x_ref[...], w1x_ref[...], preferred_element_type=jnp.float32)
        + b1_ref[...]
    )

    def step(t, h):
        h1 = jnp.maximum(
            pre_ref[pl.ds(t, 1), :]
            + jnp.dot(h, w1h_ref[...], preferred_element_type=jnp.float32),
            0.0)
        h2 = jnp.maximum(
            jnp.dot(h1, w2_ref[...], preferred_element_type=jnp.float32)
            + b2_ref[...],
            0.0)
        h3 = (jnp.dot(h2, w3_ref[...], preferred_element_type=jnp.float32)
              + b3_ref[...])
        out_ref[pl.ds(t, 1), :] = h3
        return h3                                      # carried hidden state

    # T is static -> fully unroll so the scheduler sees across steps.
    h_final = jax.lax.fori_loop(0, T, step, h0_ref[...].astype(jnp.float32),
                                unroll=True)
    hN_ref[...] = h_final


@jax.jit
def _encoder_forward_seq(xs, h0, w1x, w1h, b1, w2, b2, w3, b3):
    """xs: (T, input_size), h0: (1, HP) -> ((T, HP) hidden states, (1, HP) h_T)."""
    T = xs.shape[0]
    HP = w1h.shape[1]
    vmem = pl.BlockSpec(memory_space=pltpu.VMEM)
    return pl.pallas_call(
        _encoder_seq_kernel,
        out_shape=(jax.ShapeDtypeStruct((T, HP), jnp.float32),
                   jax.ShapeDtypeStruct((1, HP), jnp.float32)),
        in_specs=[vmem] * 9,
        out_specs=(vmem, vmem),
        scratch_shapes=[pltpu.VMEM((T, HP), jnp.float32)],
    )(xs, h0, w1x, w1h, b1, w2, b2, w3, b3)


class Encoder:
    """JAX/Pallas port of the PyTorch Encoder (stateful recurrent MLP)."""

    def __init__(self, input_size=5, hidden_size=32, key=None):
        self.input_size = input_size
        self.hidden_size = hidden_size
        # Pad hidden dim to a lane-dense size (multiple of 128, min 128).
        self.hidden_pad = max(128, ((hidden_size + 127) // 128) * 128)
        HP, H = self.hidden_pad, hidden_size

        # Padded hidden state lives on device between calls (no host slicing).
        self._h = jnp.zeros((1, HP), jnp.float32)

        if key is None:
            key = jax.random.PRNGKey(0)
        ks = jax.random.split(key, 6)

        def linear_init(kw, kb, fan_in, fan_out):
            # PyTorch nn.Linear default init: U(-1/sqrt(fan_in), 1/sqrt(fan_in))
            bound = 1.0 / float(fan_in) ** 0.5
            w = jax.random.uniform(kw, (fan_in, fan_out), jnp.float32,
                                   -bound, bound)
            b = jax.random.uniform(kb, (1, fan_out), jnp.float32,
                                   -bound, bound)
            return w, b

        d_in = input_size + H
        w1, b1 = linear_init(ks[0], ks[1], d_in, H)
        w2, b2 = linear_init(ks[2], ks[3], H, H)
        w3, b3 = linear_init(ks[4], ks[5], H, H)

        # Unpadded copies (for reference / inspection).
        self.w1, self.b1 = w1, b1
        self.w2, self.b2 = w2, b2
        self.w3, self.b3 = w3, b3

        # Kernel-side parameters: split W1 into x / h parts, zero-pad hidden
        # dims to HP. Zero padding is inert: padded lanes of every activation
        # stay exactly 0 through ReLU and the final layer, so the recurrence
        # in the first H lanes is identical to the unpadded computation.
        pc = HP - H

        def pad_cols(a):
            return jnp.pad(a, ((0, 0), (0, pc)))

        def pad_both(a):
            return jnp.pad(a, ((0, pc), (0, pc)))

        self._w1x = pad_cols(w1[:input_size])       # (input_size, HP)
        self._w1h = pad_both(w1[input_size:])       # (HP, HP)
        self._b1 = pad_cols(b1)                     # (1, HP)
        self._w2 = pad_both(w2)
        self._b2 = pad_cols(b2)
        self._w3 = pad_both(w3)
        self._b3 = pad_cols(b3)

    @property
    def hidden_state(self):
        return self._h[:, :self.hidden_size]

    def reset_hidden_state(self):
        self._h = jnp.zeros((1, self.hidden_pad), jnp.float32)

    def forward_sequence(self, xs):
        """xs: (T, input_size) -> (T, hidden_size); whole rollout in one kernel."""
        out_pad, h_final = _encoder_forward_seq(
            xs, self._h,
            self._w1x, self._w1h, self._b1,
            self._w2, self._b2,
            self._w3, self._b3)
        self._h = h_final                           # padded device-side carry
        return out_pad[:, :self.hidden_size]

    def __call__(self, x):
        """x: (1, input_size) -> (1, hidden_size); matches the PyTorch step API.

        Prefer forward_sequence for many timesteps: a single-sample step is
        dominated by per-call dispatch, not the kernel itself.
        """
        return self.forward_sequence(x)


def _reference_rollout(xs, h0, w1, b1, w2, b2, w3, b3):
    """Pure-JAX reference of the PyTorch forward, stepped over xs rows."""
    outs = []
    h = h0
    for t in range(xs.shape[0]):
        xc = jnp.concatenate([xs[t:t + 1], h], axis=1)
        h1 = jnp.maximum(xc @ w1 + b1, 0.0)
        h2 = jnp.maximum(h1 @ w2 + b2, 0.0)
        h = h2 @ w3 + b3
        outs.append(h)
    return jnp.concatenate(outs, axis=0)


if __name__ == "__main__":
    input_size, hidden_size, T = 5, 32, 8
    enc = Encoder(input_size=input_size, hidden_size=hidden_size,
                  key=jax.random.PRNGKey(0))

    xs = jax.random.normal(jax.random.PRNGKey(1), (T, input_size), jnp.float32)

    # Multi-step rollout: the whole recurrence runs inside a single kernel.
    out_seq = jax.block_until_ready(enc.forward_sequence(xs))
    assert out_seq.shape == (T, hidden_size)

    ref_seq = _reference_rollout(xs, jnp.zeros((1, hidden_size), jnp.float32),
                                 enc.w1, enc.b1, enc.w2, enc.b2, enc.w3, enc.b3)
    max_err = float(jnp.max(jnp.abs(out_seq - ref_seq)))
    assert jnp.allclose(out_seq, ref_seq, atol=1e-4, rtol=1e-4), max_err

    # Single-step API (recurrence continues from the sequence's final state).
    h_before = enc.hidden_state
    x_step = jax.random.normal(jax.random.PRNGKey(2), (1, input_size),
                               jnp.float32)
    out_step = jax.block_until_ready(enc(x_step))
    assert out_step.shape == (1, hidden_size)

    ref_step = _reference_rollout(x_step, h_before,
                                  enc.w1, enc.b1, enc.w2, enc.b2,
                                  enc.w3, enc.b3)
    assert jnp.allclose(out_step, ref_step, atol=1e-4, rtol=1e-4)

    print("KERNEL_OK")
</pallas_src>

<mosaic_0001>
module attributes {stable_mosaic.version = 11 : i64} {
  func.func @_encoder_seq_kernel(%arg0: memref<8x5xf32, #tpu.memory_space<vmem>>, %arg1: memref<1x128xf32, #tpu.memory_space<vmem>>, %arg2: memref<5x128xf32, #tpu.memory_space<vmem>>, %arg3: memref<128x128xf32, #tpu.memory_space<vmem>>, %arg4: memref<1x128xf32, #tpu.memory_space<vmem>>, %arg5: memref<128x128xf32, #tpu.memory_space<vmem>>, %arg6: memref<1x128xf32, #tpu.memory_space<vmem>>, %arg7: memref<128x128xf32, #tpu.memory_space<vmem>>, %arg8: memref<1x128xf32, #tpu.memory_space<vmem>>, %arg9: memref<8x128xf32, #tpu.memory_space<vmem>>, %arg10: memref<1x128xf32, #tpu.memory_space<vmem>>, %arg11: memref<8x128xf32, #tpu.memory_space<vmem>>) attributes {dimension_semantics = [], scalar_prefetch = 0 : i64, scratch_operands = 1 : i64, tpu.core_type = #tpu.core_type<tc>} {
    %c0 = arith.constant 0 : index
    %c0_0 = arith.constant 0 : index
    %0 = vector.load %arg0[%c0, %c0_0] : memref<8x5xf32, #tpu.memory_space<vmem>>, vector<8x5xf32>
    %c0_1 = arith.constant 0 : index
    %c0_2 = arith.constant 0 : index
    %1 = vector.load %arg2[%c0_1, %c0_2] : memref<5x128xf32, #tpu.memory_space<vmem>>, vector<5x128xf32>
    %cst = arith.constant dense<0.000000e+00> : vector<8x128xf32>
    %2 = tpu.matmul %0, %1, %cst {dimension_numbers = #tpu.dot_dimension_numbers<[1], [0], [0], [1], [0, 0, 1, 1], [], []>} : vector<8x5xf32>, vector<5x128xf32>, vector<8x128xf32> -> vector<8x128xf32>
    %c0_3 = arith.constant 0 : index
    %c0_4 = arith.constant 0 : index
    %3 = vector.load %arg4[%c0_3, %c0_4] : memref<1x128xf32, #tpu.memory_space<vmem>>, vector<1x128xf32>
    %4 = vector.broadcast %3 : vector<1x128xf32> to vector<8x128xf32>
    %5 = arith.addf %2, %4 : vector<8x128xf32>
    %c0_5 = arith.constant 0 : index
    %c0_6 = arith.constant 0 : index
    %6 = vector.load %arg11[%c0_5, %c0_6] : memref<8x128xf32, #tpu.memory_space<vmem>>, vector<8x128xf32>
    tpu.vector_store %arg11[%c0_5, %c0_6], %5 {strides = array<i32>} : memref<8x128xf32, #tpu.memory_space<vmem>>, vector<8x128xf32>,
    %c0_7 = arith.constant 0 : index
    %c0_8 = arith.constant 0 : index
    %7 = vector.load %arg1[%c0_7, %c0_8] : memref<1x128xf32, #tpu.memory_space<vmem>>, vector<1x128xf32>
    %c0_i32 = arith.constant 0 : i32
    %8 = arith.index_cast %c0_i32 : i32 to index
    %c0_9 = arith.constant 0 : index
    %9 = vector.load %arg11[%8, %c0_9] : memref<8x128xf32, #tpu.memory_space<vmem>>, vector<1x128xf32>
    %c0_10 = arith.constant 0 : index
    %c0_11 = arith.constant 0 : index
    %10 = vector.load %arg3[%c0_10, %c0_11] : memref<128x128xf32, #tpu.memory_space<vmem>>, vector<128x128xf32>
    %cst_12 = arith.constant dense<0.000000e+00> : vector<1x128xf32>
    %11 = tpu.matmul %7, %10, %cst_12 {dimension_numbers = #tpu.dot_dimension_numbers<[1], [0], [0], [1], [0, 0, 1, 1], [], []>} : vector<1x128xf32>, vector<128x128xf32>, vector<1x128xf32> -> vector<1x128xf32>
    %12 = arith.addf %9, %11 : vector<1x128xf32>
    %cst_13 = arith.constant 0.000000e+00 : f32
    %13 = vector.broadcast %cst_13 : f32 to vector<1x128xf32>
    %14 = arith.maximumf %12, %13 : vector<1x128xf32>
    %c0_14 = arith.constant 0 : index
    %c0_15 = arith.constant 0 : index
    %15 = vector.load %arg5[%c0_14, %c0_15] : memref<128x128xf32, #tpu.memory_space<vmem>>, vector<128x128xf32>
    %cst_16 = arith.constant dense<0.000000e+00> : vector<1x128xf32>
    %16 = tpu.matmul %14, %15, %cst_16 {dimension_numbers = #tpu.dot_dimension_numbers<[1], [0], [0], [1], [0, 0, 1, 1], [], []>} : vector<1x128xf32>, vector<128x128xf32>, vector<1x128xf32> -> vector<1x128xf32>
    %c0_17 = arith.constant 0 : index
    %c0_18 = arith.constant 0 : index
    %17 = vector.load %arg6[%c0_17, %c0_18] : memref<1x128xf32, #tpu.memory_space<vmem>>, vector<1x128xf32>
    %18 = arith.addf %16, %17 : vector<1x128xf32>
    %cst_19 = arith.constant 0.000000e+00 : f32
    %19 = vector.broadcast %cst_19 : f32 to vector<1x128xf32>
    %20 = arith.maximumf %18, %19 : vector<1x128xf32>
    %c0_20 = arith.constant 0 : index
    %c0_21 = arith.constant 0 : index
    %21 = vector.load %arg7[%c0_20, %c0_21] : memref<128x128xf32, #tpu.memory_space<vmem>>, vector<128x128xf32>
    %cst_22 = arith.constant dense<0.000000e+00> : vector<1x128xf32>
    %22 = tpu.matmul %20, %21, %cst_22 {dimension_numbers = #tpu.dot_dimension_numbers<[1], [0], [0], [1], [0, 0, 1, 1], [], []>} : vector<1x128xf32>, vector<128x128xf32>, vector<1x128xf32> -> vector<1x128xf32>
    %c0_23 = arith.constant 0 : index
    %c0_24 = arith.constant 0 : index
    %23 = vector.load %arg8[%c0_23, %c0_24] : memref<1x128xf32, #tpu.memory_space<vmem>>, vector<1x128xf32>
    %24 = arith.addf %22, %23 : vector<1x128xf32>
    %25 = arith.index_cast %c0_i32 : i32 to index
    %c0_25 = arith.constant 0 : index
    %26 = vector.load %arg9[%25, %c0_25] : memref<8x128xf32, #tpu.memory_space<vmem>>, vector<1x128xf32>
    tpu.vector_store %arg9[%25, %c0_25], %24 {strides = array<i32>} : memref<8x128xf32, #tpu.memory_space<vmem>>, vector<1x128xf32>,
    %c1_i32 = arith.constant 1 : i32
    %27 = arith.index_cast %c1_i32 : i32 to index
    %c0_26 = arith.constant 0 : index
    %28 = vector.load %arg11[%27, %c0_26] : memref<8x128xf32, #tpu.memory_space<vmem>>, vector<1x128xf32>
    %c0_27 = arith.constant 0 : index
    %c0_28 = arith.constant 0 : index
    %29 = vector.load %arg3[%c0_27, %c0_28] : memref<128x128xf32, #tpu.memory_space<vmem>>, vector<128x128xf32>
    %cst_29 = arith.constant dense<0.000000e+00> : vector<1x128xf32>
    %30 = tpu.matmul %24, %29, %cst_29 {dimension_numbers = #tpu.dot_dimension_numbers<[1], [0], [0], [1], [0, 0, 1, 1], [], []>} : vector<1x128xf32>, vector<128x128xf32>, vector<1x128xf32> -> vector<1x128xf32>
    %31 = arith.addf %28, %30 : vector<1x128xf32>
    %cst_30 = arith.constant 0.000000e+00 : f32
    %32 = vector.broadcast %cst_30 : f32 to vector<1x128xf32>
    %33 = arith.maximumf %31, %32 : vector<1x128xf32>
    %c0_31 = arith.constant 0 : index
    %c0_32 = arith.constant 0 : index
    %34 = vector.load %arg5[%c0_31, %c0_32] : memref<128x128xf32, #tpu.memory_space<vmem>>, vector<128x128xf32>
    %cst_33 = arith.constant dense<0.000000e+00> : vector<1x128xf32>
    %35 = tpu.matmul %33, %34, %cst_33 {dimension_numbers = #tpu.dot_dimension_numbers<[1], [0], [0], [1], [0, 0, 1, 1], [], []>} : vector<1x128xf32>, vector<128x128xf32>, vector<1x128xf32> -> vector<1x128xf32>
    %c0_34 = arith.constant 0 : index
    %c0_35 = arith.constant 0 : index
    %36 = vector.load %arg6[%c0_34, %c0_35] : memref<1x128xf32, #tpu.memory_space<vmem>>, vector<1x128xf32>
    %37 = arith.addf %35, %36 : vector<1x128xf32>
    %cst_36 = arith.constant 0.000000e+00 : f32
    %38 = vector.broadcast %cst_36 : f32 to vector<1x128xf32>
    %39 = arith.maximumf %37, %38 : vector<1x128xf32>
    %c0_37 = arith.constant 0 : index
    %c0_38 = arith.constant 0 : index
    %40 = vector.load %arg7[%c0_37, %c0_38] : memref<128x128xf32, #tpu.memory_space<vmem>>, vector<128x128xf32>
    %cst_39 = arith.constant dense<0.000000e+00> : vector<1x128xf32>
    %41 = tpu.matmul %39, %40, %cst_39 {dimension_numbers = #tpu.dot_dimension_numbers<[1], [0], [0], [1], [0, 0, 1, 1], [], []>} : vector<1x128xf32>, vector<128x128xf32>, vector<1x128xf32> -> vector<1x128xf32>
    %c0_40 = arith.constant 0 : index
    %c0_41 = arith.constant 0 : index
    %42 = vector.load %arg8[%c0_40, %c0_41] : memref<1x128xf32, #tpu.memory_space<vmem>>, vector<1x128xf32>
    %43 = arith.addf %41, %42 : vector<1x128xf32>
    %44 = arith.index_cast %c1_i32 : i32 to index
    %c0_42 = arith.constant 0 : index
    %45 = vector.load %arg9[%44, %c0_42] : memref<8x128xf32, #tpu.memory_space<vmem>>, vector<1x128xf32>
    tpu.vector_store %arg9[%44, %c0_42], %43 {strides = array<i32>} : memref<8x128xf32, #tpu.memory_space<vmem>>, vector<1x128xf32>,
    %c2_i32 = arith.constant 2 : i32
    %46 = arith.index_cast %c2_i32 : i32 to index
    %c0_43 = arith.constant 0 : index
    %47 = vector.load %arg11[%46, %c0_43] : memref<8x128xf32, #tpu.memory_space<vmem>>, vector<1x128xf32>
    %c0_44 = arith.constant 0 : index
    %c0_45 = arith.constant 0 : index
    %48 = vector.load %arg3[%c0_44, %c0_45] : memref<128x128xf32, #tpu.memory_space<vmem>>, vector<128x128xf32>
    %cst_46 = arith.constant dense<0.000000e+00> : vector<1x128xf32>
    %49 = tpu.matmul %43, %48, %cst_46 {dimension_numbers = #tpu.dot_dimension_numbers<[1], [0], [0], [1], [0, 0, 1, 1], [], []>} : vector<1x128xf32>, vector<128x128xf32>, vector<1x128xf32> -> vector<1x128xf32>
    %50 = arith.addf %47, %49 : vector<1x128xf32>
    %cst_47 = arith.constant 0.000000e+00 : f32
    %51 = vector.broadcast %cst_47 : f32 to vector<1x128xf32>
    %52 = arith.maximumf %50, %51 : vector<1x128xf32>
    %c0_48 = arith.constant 0 : index
    %c0_49 = arith.constant 0 : index
    %53 = vector.load %arg5[%c0_48, %c0_49] : memref<128x128xf32, #tpu.memory_space<vmem>>, vector<128x128xf32>
    %cst_50 = arith.constant dense<0.000000e+00> : vector<1x128xf32>
    %54 = tpu.matmul %52, %53, %cst_50 {dimension_numbers = #tpu.dot_dimension_numbers<[1], [0], [0], [1], [0, 0, 1, 1], [], []>} : vector<1x128xf32>, vector<128x128xf32>, vector<1x128xf32> -> vector<1x128xf32>
    %c0_51 = arith.constant 0 : index
    %c0_52 = arith.constant 0 : index
    %55 = vector.load %arg6[%c0_51, %c0_52] : memref<1x128xf32, #tpu.memory_space<vmem>>, vector<1x128xf32>
    %56 = arith.addf %54, %55 : vector<1x128xf32>
    %cst_53 = arith.constant 0.000000e+00 : f32
    %57 = vector.broadcast %cst_53 : f32 to vector<1x128xf32>
    %58 = arith.maximumf %56, %57 : vector<1x128xf32>
    %c0_54 = arith.constant 0 : index
    %c0_55 = arith.constant 0 : index
    %59 = vector.load %arg7[%c0_54, %c0_55] : memref<128x128xf32, #tpu.memory_space<vmem>>, vector<128x128xf32>
    %cst_56 = arith.constant dense<0.000000e+00> : vector<1x128xf32>
    %60 = tpu.matmul %58, %59, %cst_56 {dimension_numbers = #tpu.dot_dimension_numbers<[1], [0], [0], [1], [0, 0, 1, 1], [], []>} : vector<1x128xf32>, vector<128x128xf32>, vector<1x128xf32> -> vector<1x128xf32>
    %c0_57 = arith.constant 0 : index
    %c0_58 = arith.constant 0 : index
    %61 = vector.load %arg8[%c0_57, %c0_58] : memref<1x128xf32, #tpu.memory_space<vmem>>, vector<1x128xf32>
    %62 = arith.addf %60, %61 : vector<1x128xf32>
    %63 = arith.index_cast %c2_i32 : i32 to index
    %c0_59 = arith.constant 0 : index
    %64 = vector.load %arg9[%63, %c0_59] : memref<8x128xf32, #tpu.memory_space<vmem>>, vector<1x128xf32>
    tpu.vector_store %arg9[%63, %c0_59], %62 {strides = array<i32>} : memref<8x128xf32, #tpu.memory_space<vmem>>, vector<1x128xf32>,
    %c3_i32 = arith.constant 3 : i32
    %65 = arith.index_cast %c3_i32 : i32 to index
    %c0_60 = arith.constant 0 : index
    %66 = vector.load %arg11[%65, %c0_60] : memref<8x128xf32, #tpu.memory_space<vmem>>, vector<1x128xf32>
    %c0_61 = arith.constant 0 : index
    %c0_62 = arith.constant 0 : index
    %67 = vector.load %arg3[%c0_61, %c0_62] : memref<128x128xf32, #tpu.memory_space<vmem>>, vector<128x128xf32>
    %cst_63 = arith.constant dense<0.000000e+00> : vector<1x128xf32>
    %68 = tpu.matmul %62, %67, %cst_63 {dimension_numbers = #tpu.dot_dimension_numbers<[1], [0], [0], [1], [0, 0, 1, 1], [], []>} : vector<1x128xf32>, vector<128x128xf32>, vector<1x128xf32> -> vector<1x128xf32>
    %69 = arith.addf %66, %68 : vector<1x128xf32>
    %cst_64 = arith.constant 0.000000e+00 : f32
    %70 = vector.broadcast %cst_64 : f32 to vector<1x128xf32>
    %71 = arith.maximumf %69, %70 : vector<1x128xf32>
    %c0_65 = arith.constant 0 : index
    %c0_66 = arith.constant 0 : index
    %72 = vector.load %arg5[%c0_65, %c0_66] : memref<128x128xf32, #tpu.memory_space<vmem>>, vector<128x128xf32>
    %cst_67 = arith.constant dense<0.000000e+00> : vector<1x128xf32>
    %73 = tpu.matmul %71, %72, %cst_67 {dimension_numbers = #tpu.dot_dimension_numbers<[1], [0], [0], [1], [0, 0, 1, 1], [], []>} : vector<1x128xf32>, vector<128x128xf32>, vector<1x128xf32> -> vector<1x128xf32>
    %c0_68 = arith.constant 0 : index
    %c0_69 = arith.constant 0 : index
    %74 = vector.load %arg6[%c0_68, %c0_69] : memref<1x128xf32, #tpu.memory_space<vmem>>, vector<1x128xf32>
    %75 = arith.addf %73, %74 : vector<1x128xf32>
    %cst_70 = arith.constant 0.000000e+00 : f32
    %76 = vector.broadcast %cst_70 : f32 to vector<1x128xf32>
    %77 = arith.maximumf %75, %76 : vector<1x128xf32>
    %c0_71 = arith.constant 0 : index
    %c0_72 = arith.constant 0 : index
    %78 = vector.load %arg7[%c0_71, %c0_72] : memref<128x128xf32, #tpu.memory_space<vmem>>, vector<128x128xf32>
    %cst_73 = arith.constant dense<0.000000e+00> : vector<1x128xf32>
    %79 = tpu.matmul %77, %78, %cst_73 {dimension_numbers = #tpu.dot_dimension_numbers<[1], [0], [0], [1], [0, 0, 1, 1], [], []>} : vector<1x128xf32>, vector<128x128xf32>, vector<1x128xf32> -> vector<1x128xf32>
    %c0_74 = arith.constant 0 : index
    %c0_75 = arith.constant 0 : index
    %80 = vector.load %arg8[%c0_74, %c0_75] : memref<1x128xf32, #tpu.memory_space<vmem>>, vector<1x128xf32>
    %81 = arith.addf %79, %80 : vector<1x128xf32>
    %82 = arith.index_cast %c3_i32 : i32 to index
    %c0_76 = arith.constant 0 : index
    %83 = vector.load %arg9[%82, %c0_76] : memref<8x128xf32, #tpu.memory_space<vmem>>, vector<1x128xf32>
    tpu.vector_store %arg9[%82, %c0_76], %81 {strides = array<i32>} : memref<8x128xf32, #tpu.memory_space<vmem>>, vector<1x128xf32>,
    %c4_i32 = arith.constant 4 : i32
    %84 = arith.index_cast %c4_i32 : i32 to index
    %c0_77 = arith.constant 0 : index
    %85 = vector.load %arg11[%84, %c0_77] : memref<8x128xf32, #tpu.memory_space<vmem>>, vector<1x128xf32>
    %c0_78 = arith.constant 0 : index
    %c0_79 = arith.constant 0 : index
    %86 = vector.load %arg3[%c0_78, %c0_79] : memref<128x128xf32, #tpu.memory_space<vmem>>, vector<128x128xf32>
    %cst_80 = arith.constant dense<0.000000e+00> : vector<1x128xf32>
    %87 = tpu.matmul %81, %86, %cst_80 {dimension_numbers = #tpu.dot_dimension_numbers<[1], [0], [0], [1], [0, 0, 1, 1], [], []>} : vector<1x128xf32>, vector<128x128xf32>, vector<1x128xf32> -> vector<1x128xf32>
    %88 = arith.addf %85, %87 : vector<1x128xf32>
    %cst_81 = arith.constant 0.000000e+00 : f32
    %89 = vector.broadcast %cst_81 : f32 to vector<1x128xf32>
    %90 = arith.maximumf %88, %89 : vector<1x128xf32>
    %c0_82 = arith.constant 0 : index
    %c0_83 = arith.constant 0 : index
    %91 = vector.load %arg5[%c0_82, %c0_83] : memref<128x128xf32, #tpu.memory_space<vmem>>, vector<128x128xf32>
    %cst_84 = arith.constant dense<0.000000e+00> : vector<1x128xf32>
    %92 = tpu.matmul %90, %91, %cst_84 {dimension_numbers = #tpu.dot_dimension_numbers<[1], [0], [0], [1], [0, 0, 1, 1], [], []>} : vector<1x128xf32>, vector<128x128xf32>, vector<1x128xf32> -> vector<1x128xf32>
    %c0_85 = arith.constant 0 : index
    %c0_86 = arith.constant 0 : index
    %93 = vector.load %arg6[%c0_85, %c0_86] : memref<1x128xf32, #tpu.memory_space<vmem>>, vector<1x128xf32>
    %94 = arith.addf %92, %93 : vector<1x128xf32>
    %cst_87 = arith.constant 0.000000e+00 : f32
    %95 = vector.broadcast %cst_87 : f32 to vector<1x128xf32>
    %96 = arith.maximumf %94, %95 : vector<1x128xf32>
    %c0_88 = arith.constant 0 : index
    %c0_89 = arith.constant 0 : index
    %97 = vector.load %arg7[%c0_88, %c0_89] : memref<128x128xf32, #tpu.memory_space<vmem>>, vector<128x128xf32>
    %cst_90 = arith.constant dense<0.000000e+00> : vector<1x128xf32>
    %98 = tpu.matmul %96, %97, %cst_90 {dimension_numbers = #tpu.dot_dimension_numbers<[1], [0], [0], [1], [0, 0, 1, 1], [], []>} : vector<1x128xf32>, vector<128x128xf32>, vector<1x128xf32> -> vector<1x128xf32>
    %c0_91 = arith.constant 0 : index
    %c0_92 = arith.constant 0 : index
    %99 = vector.load %arg8[%c0_91, %c0_92] : memref<1x128xf32, #tpu.memory_space<vmem>>, vector<1x128xf32>
    %100 = arith.addf %98, %99 : vector<1x128xf32>
    %101 = arith.index_cast %c4_i32 : i32 to index
    %c0_93 = arith.constant 0 : index
    %102 = vector.load %arg9[%101, %c0_93] : memref<8x128xf32, #tpu.memory_space<vmem>>, vector<1x128xf32>
    tpu.vector_store %arg9[%101, %c0_93], %100 {strides = array<i32>} : memref<8x128xf32, #tpu.memory_space<vmem>>, vector<1x128xf32>,
    %c5_i32 = arith.constant 5 : i32
    %103 = arith.index_cast %c5_i32 : i32 to index
    %c0_94 = arith.constant 0 : index
    %104 = vector.load %arg11[%103, %c0_94] : memref<8x128xf32, #tpu.memory_space<vmem>>, vector<1x128xf32>
    %c0_95 = arith.constant 0 : index
    %c0_96 = arith.constant 0 : index
    %105 = vector.load %arg3[%c0_95, %c0_96] : memref<128x128xf32, #tpu.memory_space<vmem>>, vector<128x128xf32>
    %cst_97 = arith.constant dense<0.000000e+00> : vector<1x128xf32>
    %106 = tpu.matmul %100, %105, %cst_97 {dimension_numbers = #tpu.dot_dimension_numbers<[1], [0], [0], [1], [0, 0, 1, 1], [], []>} : vector<1x128xf32>, vector<128x128xf32>, vector<1x128xf32> -> vector<1x128xf32>
    %107 = arith.addf %104, %106 : vector<1x128xf32>
    %cst_98 = arith.constant 0.000000e+00 : f32
    %108 = vector.broadcast %cst_98 : f32 to vector<1x128xf32>
    %109 = arith.maximumf %107, %108 : vector<1x128xf32>
    %c0_99 = arith.constant 0 : index
    %c0_100 = arith.constant 0 : index
    %110 = vector.load %arg5[%c0_99, %c0_100] : memref<128x128xf32, #tpu.memory_space<vmem>>, vector<128x128xf32>
    %cst_101 = arith.constant dense<0.000000e+00> : vector<1x128xf32>
    %111 = tpu.matmul %109, %110, %cst_101 {dimension_numbers = #tpu.dot_dimension_numbers<[1], [0], [0], [1], [0, 0, 1, 1], [], []>} : vector<1x128xf32>, vector<128x128xf32>, vector<1x128xf32> -> vector<1x128xf32>
    %c0_102 = arith.constant 0 : index
    %c0_103 = arith.constant 0 : index
    %112 = vector.load %arg6[%c0_102, %c0_103] : memref<1x128xf32, #tpu.memory_space<vmem>>, vector<1x128xf32>
    %113 = arith.addf %111, %112 : vector<1x128xf32>
    %cst_104 = arith.constant 0.000000e+00 : f32
    %114 = vector.broadcast %cst_104 : f32 to vector<1x128xf32>
    %115 = arith.maximumf %113, %114 : vector<1x128xf32>
    %c0_105 = arith.constant 0 : index
    %c0_106 = arith.constant 0 : index
    %116 = vector.load %arg7[%c0_105, %c0_106] : memref<128x128xf32, #tpu.memory_space<vmem>>, vector<128x128xf32>
    %cst_107 = arith.constant dense<0.000000e+00> : vector<1x128xf32>
    %117 = tpu.matmul %115, %116, %cst_107 {dimension_numbers = #tpu.dot_dimension_numbers<[1], [0], [0], [1], [0, 0, 1, 1], [], []>} : vector<1x128xf32>, vector<128x128xf32>, vector<1x128xf32> -> vector<1x128xf32>
    %c0_108 = arith.constant 0 : index
    %c0_109 = arith.constant 0 : index
    %118 = vector.load %arg8[%c0_108, %c0_109] : memref<1x128xf32, #tpu.memory_space<vmem>>, vector<1x128xf32>
    %119 = arith.addf %117, %118 : vector<1x128xf32>
    %120 = arith.index_cast %c5_i32 : i32 to index
    %c0_110 = arith.constant 0 : index
    %121 = vector.load %arg9[%120, %c0_110] : memref<8x128xf32, #tpu.memory_space<vmem>>, vector<1x128xf32>
    tpu.vector_store %arg9[%120, %c0_110], %119 {strides = array<i32>} : memref<8x128xf32, #tpu.memory_space<vmem>>, vector<1x128xf32>,
    %c6_i32 = arith.constant 6 : i32
    %122 = arith.index_cast %c6_i32 : i32 to index
    %c0_111 = arith.constant 0 : index
    %123 = vector.load %arg11[%122, %c0_111] : memref<8x128xf32, #tpu.memory_space<vmem>>, vector<1x128xf32>
    %c0_112 = arith.constant 0 : index
    %c0_113 = arith.constant 0 : index
    %124 = vector.load %arg3[%c0_112, %c0_113] : memref<128x128xf32, #tpu.memory_space<vmem>>, vector<128x128xf32>
    %cst_114 = arith.constant dense<0.000000e+00> : vector<1x128xf32>
    %125 = tpu.matmul %119, %124, %cst_114 {dimension_numbers = #tpu.dot_dimension_numbers<[1], [0], [0], [1], [0, 0, 1, 1], [], []>} : vector<1x128xf32>, vector<128x128xf32>, vector<1x128xf32> -> vector<1x128xf32>
    %126 = arith.addf %123, %125 : vector<1x128xf32>
    %cst_115 = arith.constant 0.000000e+00 : f32
    %127 = vector.broadcast %cst_115 : f32 to vector<1x128xf32>
    %128 = arith.maximumf %126, %127 : vector<1x128xf32>
    %c0_116 = arith.constant 0 : index
    %c0_117 = arith.constant 0 : index
    %129 = vector.load %arg5[%c0_116, %c0_117] : memref<128x128xf32, #tpu.memory_space<vmem>>, vector<128x128xf32>
    %cst_118 = arith.constant dense<0.000000e+00> : vector<1x128xf32>
    %130 = tpu.matmul %128, %129, %cst_118 {dimension_numbers = #tpu.dot_dimension_numbers<[1], [0], [0], [1], [0, 0, 1, 1], [], []>} : vector<1x128xf32>, vector<128x128xf32>, vector<1x128xf32> -> vector<1x128xf32>
    %c0_119 = arith.constant 0 : index
    %c0_120 = arith.constant 0 : index
    %131 = vector.load %arg6[%c0_119, %c0_120] : memref<1x128xf32, #tpu.memory_space<vmem>>, vector<1x128xf32>
    %132 = arith.addf %130, %131 : vector<1x128xf32>
    %cst_121 = arith.constant 0.000000e+00 : f32
    %133 = vector.broadcast %cst_121 : f32 to vector<1x128xf32>
    %134 = arith.maximumf %132, %133 : vector<1x128xf32>
    %c0_122 = arith.constant 0 : index
    %c0_123 = arith.constant 0 : index
    %135 = vector.load %arg7[%c0_122, %c0_123] : memref<128x128xf32, #tpu.memory_space<vmem>>, vector<128x128xf32>
    %cst_124 = arith.constant dense<0.000000e+00> : vector<1x128xf32>
    %136 = tpu.matmul %134, %135, %cst_124 {dimension_numbers = #tpu.dot_dimension_numbers<[1], [0], [0], [1], [0, 0, 1, 1], [], []>} : vector<1x128xf32>, vector<128x128xf32>, vector<1x128xf32> -> vector<1x128xf32>
    %c0_125 = arith.constant 0 : index
    %c0_126 = arith.constant 0 : index
    %137 = vector.load %arg8[%c0_125, %c0_126] : memref<1x128xf32, #tpu.memory_space<vmem>>, vector<1x128xf32>
    %138 = arith.addf %136, %137 : vector<1x128xf32>
    %139 = arith.index_cast %c6_i32 : i32 to index
    %c0_127 = arith.constant 0 : index
    %140 = vector.load %arg9[%139, %c0_127] : memref<8x128xf32, #tpu.memory_space<vmem>>, vector<1x128xf32>
    tpu.vector_store %arg9[%139, %c0_127], %138 {strides = array<i32>} : memref<8x128xf32, #tpu.memory_space<vmem>>, vector<1x128xf32>,
    %c7_i32 = arith.constant 7 : i32
    %141 = arith.index_cast %c7_i32 : i32 to index
    %c0_128 = arith.constant 0 : index
    %142 = vector.load %arg11[%141, %c0_128] : memref<8x128xf32, #tpu.memory_space<vmem>>, vector<1x128xf32>
    %c0_129 = arith.constant 0 : index
    %c0_130 = arith.constant 0 : index
    %143 = vector.load %arg3[%c0_129, %c0_130] : memref<128x128xf32, #tpu.memory_space<vmem>>, vector<128x128xf32>
    %cst_131 = arith.constant dense<0.000000e+00> : vector<1x128xf32>
    %144 = tpu.matmul %138, %143, %cst_131 {dimension_numbers = #tpu.dot_dimension_numbers<[1], [0], [0], [1], [0, 0, 1, 1], [], []>} : vector<1x128xf32>, vector<128x128xf32>, vector<1x128xf32> -> vector<1x128xf32>
    %145 = arith.addf %142, %144 : vector<1x128xf32>
    %cst_132 = arith.constant 0.000000e+00 : f32
    %146 = vector.broadcast %cst_132 : f32 to vector<1x128xf32>
    %147 = arith.maximumf %145, %146 : vector<1x128xf32>
    %c0_133 = arith.constant 0 : index
    %c0_134 = arith.constant 0 : index
    %148 = vector.load %arg5[%c0_133, %c0_134] : memref<128x128xf32, #tpu.memory_space<vmem>>, vector<128x128xf32>
    %cst_135 = arith.constant dense<0.000000e+00> : vector<1x128xf32>
    %149 = tpu.matmul %147, %148, %cst_135 {dimension_numbers = #tpu.dot_dimension_numbers<[1], [0], [0], [1], [0, 0, 1, 1], [], []>} : vector<1x128xf32>, vector<128x128xf32>, vector<1x128xf32> -> vector<1x128xf32>
    %c0_136 = arith.constant 0 : index
    %c0_137 = arith.constant 0 : index
    %150 = vector.load %arg6[%c0_136, %c0_137] : memref<1x128xf32, #tpu.memory_space<vmem>>, vector<1x128xf32>
    %151 = arith.addf %149, %150 : vector<1x128xf32>
    %cst_138 = arith.constant 0.000000e+00 : f32
    %152 = vector.broadcast %cst_138 : f32 to vector<1x128xf32>
    %153 = arith.maximumf %151, %152 : vector<1x128xf32>
    %c0_139 = arith.constant 0 : index
    %c0_140 = arith.constant 0 : index
    %154 = vector.load %arg7[%c0_139, %c0_140] : memref<128x128xf32, #tpu.memory_space<vmem>>, vector<128x128xf32>
    %cst_141 = arith.constant dense<0.000000e+00> : vector<1x128xf32>
    %155 = tpu.matmul %153, %154, %cst_141 {dimension_numbers = #tpu.dot_dimension_numbers<[1], [0], [0], [1], [0, 0, 1, 1], [], []>} : vector<1x128xf32>, vector<128x128xf32>, vector<1x128xf32> -> vector<1x128xf32>
    %c0_142 = arith.constant 0 : index
    %c0_143 = arith.constant 0 : index
    %156 = vector.load %arg8[%c0_142, %c0_143] : memref<1x128xf32, #tpu.memory_space<vmem>>, vector<1x128xf32>
    %157 = arith.addf %155, %156 : vector<1x128xf32>
    %158 = arith.index_cast %c7_i32 : i32 to index
    %c0_144 = arith.constant 0 : index
    %159 = vector.load %arg9[%158, %c0_144] : memref<8x128xf32, #tpu.memory_space<vmem>>, vector<1x128xf32>
    tpu.vector_store %arg9[%158, %c0_144], %157 {strides = array<i32>} : memref<8x128xf32, #tpu.memory_space<vmem>>, vector<1x128xf32>,
    %c8_i32 = arith.constant 8 : i32
    %c0_145 = arith.constant 0 : index
    %c0_146 = arith.constant 0 : index
    %160 = vector.load %arg10[%c0_145, %c0_146] : memref<1x128xf32, #tpu.memory_space<vmem>>, vector<1x128xf32>
    tpu.vector_store %arg10[%c0_145, %c0_146], %157 {strides = array<i32>} : memref<1x128xf32, #tpu.memory_space<vmem>>, vector<1x128xf32>,
    return
  }
}

</mosaic_0001>

<bundles_post_ra>
// kernel: _encoder_forward_seq.1
= control target key start
LH: loop header
LB: loop body
LE: loop exit
PB: predicated region body
PF: predicated region fallthrough
CT: control target
= control target key end

     0   :  { %16 = vsyncpa [#allocation4], 0  ;;  %s1890_s0 = inlined_call_operand.hbm [shape: f32[8,5], index: 0, kind: input, shape index: {}]   ;;  %s1891_s1 = inlined_call_operand.hbm [shape: f32[1,128], index: 1, kind: input, shape index: {}]   ;;  %s1892_s2 = inlined_call_operand.hbm [shape: f32[5,128], index: 2, kind: input, shape index: {}]   ;;  %s1893_s3 = inlined_call_operand.hbm [shape: f32[128,128], index: 3, kind: input, shape index: {}]   ;;  %s1894_s4 = inlined_call_operand.vmem [shape: f32[1,128], index: 4, kind: input, shape index: {}]   ;;  %s1895_s5 = inlined_call_operand.hbm [shape: f32[128,128], index: 5, kind: input, shape index: {}]   ;;  %s1896_s6 = inlined_call_operand.vmem [shape: f32[1,128], index: 6, kind: input, shape index: {}]   ;;  %s1897_s7 = inlined_call_operand.hbm [shape: f32[128,128], index: 7, kind: input, shape index: {}]   ;;  %s1898_s8 = inlined_call_operand.vmem [shape: f32[1,128], index: 8, kind: input, shape index: {}]   ;;  %s1899_s9 = inlined_call_operand.hbm [shape: f32[8,128], index: 9, kind: output, shape index: {0}]   ;;  %s1900_s10 = inlined_call_operand.hbm [shape: f32[1,128], index: 10, kind: output, shape index: {1}]  }
   0x1   :  { %17 = vsyncpa [#allocation7], 0 }
   0x2   :  { %18 = vsyncpa [#allocation10], 0 }
   0x3   :  { %19 = vsyncpa [#allocation13], 0 }
   0x4   :  { %20 = vsyncpa [#allocation5], 0  ;;  %s38_s15 = sshll.u32 %s1891_s1, 4  ;;  %s39_s15 = int_to_ptr.hbm [resolvable:$true] %s38_s15 }
   0x5   :  { %21 = vsyncpa [#allocation16], 0  ;;  %s1334_s16 = smov [#allocation6]   ;;  %s59_s20 = sshll.u32 %s1893_s3, 4  ;;  %s60_s20 = int_to_ptr.hbm [resolvable:$true] %s59_s20 }
   0x6   :  { %s40_s17 = sshll.u32 %s1334_s16, 4  ;;  %s1335_s21 = smov [#allocation9]   ;;  %s41_s17 = int_to_ptr.vmem [resolvable:$true] %s40_s17 }
   0x7   :  { %43 = dma.hbm_to_vmem [thread:$0]  %s39_s15, 16, %s41_s17, [#allocation7]  }
   0x8   :  { %s61_s22 = sshll.u32 %s1335_s21, 4  ;;  %s1336_s23 = smov 128   ;;  %s62_s22 = int_to_ptr.vmem [resolvable:$true] %s61_s22 }
   0x9   :  { %s1337_s24 = smov 8   ;;  %s27_s1 = sshll.u32 %s1890_s0, 4  ;;  %s28_s1 = int_to_ptr.hbm [resolvable:$true] %s27_s1 }
   0xa   :  { %67 = dma.hbm_to_vmem [thread:$0]  %s60_s20, 2048, %s62_s22, [#allocation10], %s1336_s23, %s1336_s23, %s1337_s24  }
   0xb   :  { %s1338_s27 = smov [#allocation3]   ;;  %s49_s3 = sshll.u32 %s1892_s2, 4  ;;  %s50_s3 = int_to_ptr.hbm [resolvable:$true] %s49_s3 }
   0xc   :  { %s29_s28 = sshll.u32 %s1338_s27, 4  ;;  %s1339_s11 = smov [#allocation8]   ;;  %s30_s28 = int_to_ptr.vmem [resolvable:$true] %s29_s28 }
   0xd   :  { %32 = dma.hbm_to_vmem [thread:$0]  %s28_s1, 128, %s30_s28, [#allocation4]  }
   0xe   :  { %s51_s12 = sshll.u32 %s1339_s11, 4  ;;  %s74_s15 = sshll.u32 %s1895_s5, 4  ;;  %s52_s12 = int_to_ptr.vmem [resolvable:$true] %s51_s12  ;;  %s75_s15 = int_to_ptr.hbm [resolvable:$true] %s74_s15 }
   0xf   :  { %54 = dma.hbm_to_vmem [thread:$0]  %s50_s3, 128, %s52_s12, [#allocation7]  }
  0x10   :  { %s89_s17 = sshll.u32 %s1897_s7, 4  ;;  %s1340_s18 = smov [#allocation11]   ;;  %s90_s17 = int_to_ptr.hbm [resolvable:$true] %s89_s17 }
  0x11   :  { %s76_s19 = sshll.u32 %s1340_s18, 4  ;;  %s1341_s2 = smov [#allocation12]   ;;  %s77_s19 = int_to_ptr.vmem [resolvable:$true] %s76_s19 }
  0x12   :  { %82 = dma.hbm_to_vmem [thread:$0]  %s75_s15, 2048, %s77_s19, [#allocation10], %s1336_s23, %s1336_s23, %s1337_s24  }
  0x13   :  { %s91_s20 = sshll.u32 %s1341_s2, 4  ;;  %s92_s20 = int_to_ptr.vmem [resolvable:$true] %s91_s20 }
  0x14   :  { %97 = dma.hbm_to_vmem [thread:$0]  %s90_s17, 2048, %s92_s20, [#allocation13], %s1336_s23, %s1336_s23, %s1337_s24  }
  0x15   :  { %1322 = dma.done.wait [#allocation4], 128  }
  0x16   :  { %1323 = vsyncadd [#allocation4], 4294967168 }
  0x17   :  { %1324 = dma.done.wait [#allocation7], 144  }
  0x18   :  { %1325 = vsyncadd [#allocation7], 4294967152 }
  0x19   :  { %1326 = dma.done.wait [#allocation10], 4096  }
  0x1a   :  { %1327 = vsyncadd [#allocation10], 4294963200 }
  0x1b   :  { %1328 = dma.done.wait [#allocation13], 2048  }
  0x1c   :  { %1329 = vsyncadd [#allocation13], 4294965248  ;;  %v1417_v0 = vld [vmem:[#allocation9 + $0x78] sm:$0xff]  ;;  %v1419_v1 = vld [vmem:[#allocation9 + $0x70] sm:$0xff]  ;;  %vm134_vm0 = vcmask 1044480   ;;  %vm130_vm1 = vcmask 39936  }
  0x1d   :  { %177 = vmatpush.msra.mxu1 %v1417_v0  ;;  %v1422_v2 = vld [vmem:[#allocation9 + $0x68] sm:$0xff]  ;;  %v125_v3 = vld [vmem:[#allocation8] sm:$0x1f]  ;;  %v1425_v4 = vld [vmem:[#allocation9 + $0x60] sm:$0xff]  ;;  %s1342_s25 = smov [#allocation14]   ;;  %s1088_s28 = sshll.u32 %s1899_s9, 4  ;;  %s1089_s28 = int_to_ptr.hbm [resolvable:$true] %s1088_s28 }
  0x1e   :  { %1117 = vmatpush.msk.msra.mxu0 %vm134_vm0, %v125_v3  ;;  %v124_v5 = vld [vmem:[#allocation3] sm:$0xff]  ;;  %v1428_v6 = vld [vmem:[#allocation9 + $0x58] sm:$0xff]  ;;  %v1446_v12 = vld [vmem:[#allocation11 + $0x60] sm:$0xff]  ;;  %s1086_s26 = sshll.u32 %s1342_s25, 4  ;;  %s1343_s29 = smov [#allocation15]   ;;  %s1087_s26 = int_to_ptr.vmem [resolvable:$true] %s1086_s26 }
  0x1f   :  { %178 = vmatpush.msra.mxu1 %v1419_v1  ;;  %1118 = vmatmul.msk.f32.vlgmr.msra.gmra.mxu0 %vm130_vm1, %v124_v5  ;;  %v1430_v7 = vld [vmem:[#allocation11 + $0x78] sm:$0xff]  ;;  %v1432_v8 = vld [vmem:[#allocation11 + $0x70] sm:$0xff]  ;;  %v1439_v10 = vld [vmem:[#allocation11 + $0x68] sm:$0xff]  ;;  %s1097_s30 = sshll.u32 %s1343_s29, 4  ;;  %s1098_s30 = int_to_ptr.vmem [resolvable:$true] %s1097_s30 }
  0x20   :  { %292 = vmatpush.msrb.mxu0 %v1417_v0  ;;  %216 = vmatpush.msra.mxu2 %v1430_v7  ;;  %v1437_v9 = vld [vmem:[#allocation9 + $0x50] sm:$0xff]  ;;  %v1444_v11 = vld [vmem:[#allocation9 + $0x48] sm:$0xff]  ;;  %v1451_v13 = vld [vmem:[#allocation9 + $0x40] sm:$0xff] }
  0x21   :  { %179 = vmatpush.msra.mxu1 %v1422_v2  ;;  %v1453_v14 = vld [vmem:[#allocation11 + $0x58] sm:$0xff]  ;;  %v1460_v16 = vld [vmem:[#allocation11 + $0x50] sm:$0xff]  ;;  %v1467_v18 = vld [vmem:[#allocation11 + $0x48] sm:$0xff] }
  0x22   :  { %293 = vmatpush.msrb.mxu0 %v1419_v1  ;;  %217 = vmatpush.msra.mxu2 %v1432_v8  ;;  %v1458_v15 = vld [vmem:[#allocation9 + $0x38] sm:$0xff]  ;;  %v1465_v17 = vld [vmem:[#allocation9 + $0x30] sm:$0xff]  ;;  %v1472_v19 = vld [vmem:[#allocation9 + $0x28] sm:$0xff] }
  0x23   :  { %180 = vmatpush.msra.mxu1 %v1425_v4  ;;  %v1474_v20 = vld [vmem:[#allocation11 + $0x40] sm:$0xff]  ;;  %v1484_v22 = vld [vmem:[#allocation9 + $0x18] sm:$0xff]  ;;  %v1488_v23 = vld [vmem:[#allocation9 + $0x10] sm:$0xff] }
  0x24   :  { %294 = vmatpush.msrb.mxu0 %v1422_v2  ;;  %218 = vmatpush.msra.mxu2 %v1439_v10  ;;  %v1479_v21 = vld [vmem:[#allocation9 + $0x20] sm:$0xff]  ;;  %v1492_v24 = vld [vmem:[#allocation9 + $0x8] sm:$0xff]  ;;  %v159_v26 = vld [vmem:[#allocation6] sm:$0x1] }
  0x25   :  { %181 = vmatpush.msra.mxu1 %v1428_v6  ;;  %v1496_v25 = vld [vmem:[#allocation9] sm:$0xff]  ;;  %v1521_v27 = vld [vmem:[#allocation11 + $0x38] sm:$0xff]  ;;  %v1523_v28 = vld [vmem:[#allocation11 + $0x30] sm:$0xff] }
  0x26   :  { %295 = vmatpush.msrb.mxu0 %v1425_v4  ;;  %219 = vmatpush.msra.mxu2 %v1446_v12  ;;  %v1527_v29 = vld [vmem:[#allocation11 + $0x28] sm:$0xff]  ;;  %v1532_v30 = vld [vmem:[#allocation11 + $0x20] sm:$0xff]  ;;  %v1537_v31 = vld [vmem:[#allocation11 + $0x18] sm:$0xff] }
  0x27   :  { %182 = vmatpush.msra.mxu1 %v1437_v9  ;;  %v1546_v32 = vld [vmem:[#allocation11 + $0x10] sm:$0xff]  ;;  %v1550_v33 = vld [vmem:[#allocation11 + $0x8] sm:$0xff]  ;;  %v1129_v34 = vld [vmem:[%s1894_s4] ss:$0 sm:$0xff] }
  0x28   :  { %296 = vmatpush.msrb.mxu0 %v1428_v6  ;;  %220 = vmatpush.msra.mxu2 %v1453_v14  ;;  %v1558_v35 = vld [vmem:[#allocation11] sm:$0xff]  ;;  %v1563_v37 = vld [vmem:[#allocation12 + $0x78] sm:$0xff]  ;;  %v1565_v38 = vld [vmem:[#allocation12 + $0x70] sm:$0xff] }
  0x29   :  { %183 = vmatpush.msra.mxu1 %v1444_v11  ;;  %254 = vmatpush.msra.mxu3 %v1563_v37  ;;  %v1570_v40 = vld [vmem:[#allocation12 + $0x68] sm:$0xff]  ;;  %v1575_v41 = vld [vmem:[#allocation12 + $0x60] sm:$0xff]  ;;  %v1580_v42 = vld [vmem:[#allocation12 + $0x58] sm:$0xff] }
  0x2a   :  { %297 = vmatpush.msrb.mxu0 %v1437_v9  ;;  %221 = vmatpush.msra.mxu2 %v1460_v16  ;;  %v1585_v43 = vld [vmem:[#allocation12 + $0x50] sm:$0xff]  ;;  %v1590_v44 = vld [vmem:[#allocation12 + $0x48] sm:$0xff]  ;;  %v1595_v45 = vld [vmem:[#allocation12 + $0x40] sm:$0xff] }
  0x2b   :  { %184 = vmatpush.msra.mxu1 %v1451_v13  ;;  %255 = vmatpush.msra.mxu3 %v1565_v38  ;;  %v1600_v46 = vld [vmem:[#allocation12 + $0x38] sm:$0xff]  ;;  %v1605_v47 = vld [vmem:[#allocation12 + $0x30] sm:$0xff]  ;;  %v1610_v48 = vld [vmem:[#allocation12 + $0x28] sm:$0xff] }
  0x2c   :  { %298 = vmatpush.msrb.mxu0 %v1444_v11  ;;  %222 = vmatpush.msra.mxu2 %v1467_v18  ;;  %v1615_v49 = vld [vmem:[#allocation12 + $0x20] sm:$0xff]  ;;  %v1620_v50 = vld [vmem:[#allocation12 + $0x18] sm:$0xff]  ;;  %v1629_v55 = vld [vmem:[#allocation12 + $0x10] sm:$0xff] }
  0x2d   :  { %185 = vmatpush.msra.mxu1 %v1458_v15  ;;  %256 = vmatpush.msra.mxu3 %v1570_v40  ;;  %v1633_v56 = vld [vmem:[#allocation12 + $0x8] sm:$0xff]  ;;  %v1638_v57 = vld [vmem:[#allocation12] sm:$0xff] }
  0x2e   :  { %299 = vmatpush.msrb.mxu0 %v1451_v13  ;;  %223 = vmatpush.msra.mxu2 %v1474_v20  ;;  %v215_v58 = vld [vmem:[%s1896_s6] sm:$0x1] }
  0x2f   :  { %186 = vmatpush.msra.mxu1 %v1465_v17  ;;  %257 = vmatpush.msra.mxu3 %v1575_v41  ;;  %v253_v62 = vld [vmem:[%s1898_s8] sm:$0x1] }
  0x30   :  { %300 = vmatpush.msrb.mxu0 %v1458_v15  ;;  %224 = vmatpush.msra.mxu2 %v1521_v27 }
  0x31   :  { %187 = vmatpush.msra.mxu1 %v1472_v19  ;;  %258 = vmatpush.msra.mxu3 %v1580_v42 }
  0x32   :  { %301 = vmatpush.msrb.mxu0 %v1465_v17  ;;  %225 = vmatpush.msra.mxu2 %v1523_v28 }
  0x33   :  { %188 = vmatpush.msra.mxu1 %v1479_v21  ;;  %259 = vmatpush.msra.mxu3 %v1585_v43 }
  0x34   :  { %302 = vmatpush.msrb.mxu0 %v1472_v19  ;;  %226 = vmatpush.msra.mxu2 %v1527_v29 }
  0x35   :  { %189 = vmatpush.msra.mxu1 %v1484_v22  ;;  %260 = vmatpush.msra.mxu3 %v1590_v44 }
  0x36   :  { %303 = vmatpush.msrb.mxu0 %v1479_v21  ;;  %227 = vmatpush.msra.mxu2 %v1532_v30 }
  0x37   :  { %190 = vmatpush.msra.mxu1 %v1488_v23  ;;  %261 = vmatpush.msra.mxu3 %v1595_v45 }
  0x38   :  { %304 = vmatpush.msrb.mxu0 %v1484_v22  ;;  %228 = vmatpush.msra.mxu2 %v1537_v31 }
  0x39   :  { %191 = vmatpush.msra.mxu1 %v1492_v24  ;;  %262 = vmatpush.msra.mxu3 %v1600_v46 }
  0x3a   :  { %305 = vmatpush.msrb.mxu0 %v1488_v23  ;;  %229 = vmatpush.msra.mxu2 %v1546_v32 }
  0x3b   :  { %192 = vmatpush.msra.mxu1 %v1496_v25  ;;  %263 = vmatpush.msra.mxu3 %v1605_v47 }
  0x3c   :  { %193 = vmatmul.f32.vlgmr.msra.gmra.mxu1 %v159_v26  ;;  %306 = vmatpush.msrb.mxu0 %v1492_v24 }
  0x3d   :  { %331 = vmatpush.msrb.mxu1 %v1430_v7  ;;  %230 = vmatpush.msra.mxu2 %v1550_v33 }
  0x3e   :  { %307 = vmatpush.msrb.mxu0 %v1496_v25  ;;  %264 = vmatpush.msra.mxu3 %v1610_v48 }
  0x3f   :  { %332 = vmatpush.msrb.mxu1 %v1432_v8  ;;  %231 = vmatpush.msra.mxu2 %v1558_v35 }
  0x40   :  { %446 = vmatpush.msra.mxu0 %v1430_v7  ;;  %265 = vmatpush.msra.mxu3 %v1615_v49 }
  0x41   :  { %333 = vmatpush.msrb.mxu1 %v1439_v10  ;;  %369 = vmatpush.msrb.mxu2 %v1563_v37 }
  0x42   :  { %447 = vmatpush.msra.mxu0 %v1432_v8  ;;  %266 = vmatpush.msra.mxu3 %v1620_v50 }
  0x43   :  { %334 = vmatpush.msrb.mxu1 %v1446_v12  ;;  %370 = vmatpush.msrb.mxu2 %v1565_v38 }
  0x44   :  { %448 = vmatpush.msra.mxu0 %v1439_v10  ;;  %267 = vmatpush.msra.mxu3 %v1629_v55 }
  0x45   :  { %335 = vmatpush.msrb.mxu1 %v1453_v14  ;;  %371 = vmatpush.msrb.mxu2 %v1570_v40 }
  0x46   :  { %449 = vmatpush.msra.mxu0 %v1446_v12  ;;  %268 = vmatpush.msra.mxu3 %v1633_v56 }
  0x47   :  { %336 = vmatpush.msrb.mxu1 %v1460_v16  ;;  %372 = vmatpush.msrb.mxu2 %v1575_v41 }
  0x48   :  { %450 = vmatpush.msra.mxu0 %v1453_v14  ;;  %269 = vmatpush.msra.mxu3 %v1638_v57 }
  0x49   :  { %337 = vmatpush.msrb.mxu1 %v1467_v18  ;;  %373 = vmatpush.msrb.mxu2 %v1580_v42 }
  0x4a   :  { %451 = vmatpush.msra.mxu0 %v1460_v16  ;;  %407 = vmatpush.msrb.mxu3 %v1417_v0 }
  0x4b   :  { %338 = vmatpush.msrb.mxu1 %v1474_v20  ;;  %374 = vmatpush.msrb.mxu2 %v1585_v43 }
  0x4c   :  { %452 = vmatpush.msra.mxu0 %v1467_v18  ;;  %408 = vmatpush.msrb.mxu3 %v1419_v1 }
  0x4d   :  { %339 = vmatpush.msrb.mxu1 %v1521_v27  ;;  %375 = vmatpush.msrb.mxu2 %v1590_v44 }
  0x4e   :  { %453 = vmatpush.msra.mxu0 %v1474_v20  ;;  %409 = vmatpush.msrb.mxu3 %v1422_v2 }
  0x4f   :  { %340 = vmatpush.msrb.mxu1 %v1523_v28  ;;  %376 = vmatpush.msrb.mxu2 %v1595_v45 }
  0x50   :  { %454 = vmatpush.msra.mxu0 %v1521_v27  ;;  %410 = vmatpush.msrb.mxu3 %v1425_v4 }
  0x51   :  { %341 = vmatpush.msrb.mxu1 %v1527_v29  ;;  %377 = vmatpush.msrb.mxu2 %v1600_v46 }
  0x52   :  { %455 = vmatpush.msra.mxu0 %v1523_v28  ;;  %411 = vmatpush.msrb.mxu3 %v1428_v6 }
  0x53   :  { %342 = vmatpush.msrb.mxu1 %v1532_v30  ;;  %378 = vmatpush.msrb.mxu2 %v1605_v47 }
  0x54   :  { %456 = vmatpush.msra.mxu0 %v1527_v29  ;;  %412 = vmatpush.msrb.mxu3 %v1437_v9 }
  0x55   :  { %343 = vmatpush.msrb.mxu1 %v1537_v31  ;;  %379 = vmatpush.msrb.mxu2 %v1610_v48 }
  0x56   :  { %457 = vmatpush.msra.mxu0 %v1532_v30  ;;  %413 = vmatpush.msrb.mxu3 %v1444_v11 }
  0x57   :  { %344 = vmatpush.msrb.mxu1 %v1546_v32  ;;  %380 = vmatpush.msrb.mxu2 %v1615_v49 }
  0x58   :  { %458 = vmatpush.msra.mxu0 %v1537_v31  ;;  %414 = vmatpush.msrb.mxu3 %v1451_v13 }
  0x59   :  { %345 = vmatpush.msrb.mxu1 %v1550_v33  ;;  %381 = vmatpush.msrb.mxu2 %v1620_v50 }
  0x5a   :  { %459 = vmatpush.msra.mxu0 %v1546_v32  ;;  %415 = vmatpush.msrb.mxu3 %v1458_v15 }
  0x5b   :  { %346 = vmatpush.msrb.mxu1 %v1558_v35  ;;  %382 = vmatpush.msrb.mxu2 %v1629_v55 }
  0x5c   :  { %460 = vmatpush.msra.mxu0 %v1550_v33  ;;  %416 = vmatpush.msrb.mxu3 %v1465_v17 }
  0x5d   :  { %484 = vmatpush.msra.mxu1 %v1563_v37  ;;  %383 = vmatpush.msrb.mxu2 %v1633_v56 }
  0x5e   :  { %461 = vmatpush.msra.mxu0 %v1558_v35  ;;  %417 = vmatpush.msrb.mxu3 %v1472_v19 }
  0x5f   :  { %485 = vmatpush.msra.mxu1 %v1565_v38  ;;  %384 = vmatpush.msrb.mxu2 %v1638_v57 }
  0x60   :  { %418 = vmatpush.msrb.mxu3 %v1479_v21 }
  0x61   :  { %486 = vmatpush.msra.mxu1 %v1570_v40 }
  0x62   :  { %419 = vmatpush.msrb.mxu3 %v1484_v22 }
  0x63   :  { %487 = vmatpush.msra.mxu1 %v1575_v41 }
  0x64   :  { %420 = vmatpush.msrb.mxu3 %v1488_v23 }
  0x65   :  { %488 = vmatpush.msra.mxu1 %v1580_v42 }
  0x66   :  { %421 = vmatpush.msrb.mxu3 %v1492_v24 }
  0x67   :  { %489 = vmatpush.msra.mxu1 %v1585_v43 }
  0x68   :  { %422 = vmatpush.msrb.mxu3 %v1496_v25 }
  0x69   :  { %490 = vmatpush.msra.mxu1 %v1590_v44 }
  0x6b   :  { %491 = vmatpush.msra.mxu1 %v1595_v45 }
  0x6d   :  { %492 = vmatpush.msra.mxu1 %v1600_v46 }
  0x6f   :  { %493 = vmatpush.msra.mxu1 %v1605_v47 }
  0x71   :  { %494 = vmatpush.msra.mxu1 %v1610_v48 }
  0x73   :  { %495 = vmatpush.msra.mxu1 %v1615_v49 }
  0x75   :  { %496 = vmatpush.msra.mxu1 %v1620_v50 }
  0x77   :  { %497 = vmatpush.msra.mxu1 %v1629_v55 }
  0x79   :  { %498 = vmatpush.msra.mxu1 %v1633_v56 }
  0x7b   :  { %499 = vmatpush.msra.mxu1 %v1638_v57 }
  0x9c   :  { %v155_v36 = vpop.f32.mrf.mxu0 }
  0x9d   :  { %v156_v39 = vadd.f32 %v1129_v34, %v155_v36 }
  0x9f   :  { %158 = vst [vmem:[#allocation2] sm:$0xff] %v156_v39  ;;  %v1782_v39 = vld [vmem:[#allocation9 + $0x70] sm:$0xff] }
  0xa6   :  { %v160_v51 = vld [vmem:[#allocation2] sm:$0x1]  ;;  %v275_v5 = vld [vmem:[#allocation2 + $0x1] sm:$0x1] }
  0xb9   :  { %v194_v52 = vpop.f32.mrf.mxu1 }
  0xba   :  { %v197_v53 = vadd.f32 %v194_v52, %v160_v51  ;;  %v1830_v51 = vld [vmem:[#allocation9 + $0x10] sm:$0xff]  ;;  %v675_v52 = vld [vmem:[%s1896_s6] sm:$0x1] }
  0xbc   :  { %v198_v54 = vmax.f32 %v197_v53, 0.0 }
  0xbe   :  { %232 = vmatmul.f32.vlgmr.msra.gmra.mxu2 %v198_v54 }
  0xbf   :  { %522 = vmatpush.msra.mxu2 %v1417_v0 }
  0xc1   :  { %523 = vmatpush.msra.mxu2 %v1419_v1 }
  0xc3   :  { %524 = vmatpush.msra.mxu2 %v1422_v2 }
  0xc5   :  { %525 = vmatpush.msra.mxu2 %v1425_v4 }
  0xc7   :  { %526 = vmatpush.msra.mxu2 %v1428_v6 }
  0xc9   :  { %527 = vmatpush.msra.mxu2 %v1437_v9 }
  0xcb   :  { %528 = vmatpush.msra.mxu2 %v1444_v11 }
  0xcd   :  { %529 = vmatpush.msra.mxu2 %v1451_v13 }
  0xcf   :  { %530 = vmatpush.msra.mxu2 %v1458_v15 }
  0xd1   :  { %531 = vmatpush.msra.mxu2 %v1465_v17 }
  0xd3   :  { %532 = vmatpush.msra.mxu2 %v1472_v19 }
  0xd5   :  { %533 = vmatpush.msra.mxu2 %v1479_v21 }
  0xd7   :  { %534 = vmatpush.msra.mxu2 %v1484_v22 }
  0xd9   :  { %535 = vmatpush.msra.mxu2 %v1488_v23 }
  0xdb   :  { %536 = vmatpush.msra.mxu2 %v1492_v24 }
  0xdd   :  { %537 = vmatpush.msra.mxu2 %v1496_v25 }
 0x141   :  { %v233_v59 = vpop.f32.mrf.mxu2 }
 0x142   :  { %v234_v60 = vadd.f32 %v233_v59, %v215_v58  ;;  %v789_v58 = vld [vmem:[#allocation11 + $0x78] sm:$0xff]  ;;  %v788_v59 = vld [vmem:[#allocation11 + $0x70] sm:$0xff] }
 0x144   :  { %v236_v61 = vmax.f32 %v234_v60, 0.0  ;;  %v787_v60 = vld [vmem:[#allocation11 + $0x68] sm:$0xff] }
 0x146   :  { %270 = vmatmul.f32.vlgmr.msra.gmra.mxu3 %v236_v61  ;;  %v786_v61 = vld [vmem:[#allocation11 + $0x60] sm:$0xff] }
 0x147   :  { %561 = vmatpush.msra.mxu3 %v1430_v7 }
 0x149   :  { %562 = vmatpush.msra.mxu3 %v1432_v8 }
 0x14b   :  { %563 = vmatpush.msra.mxu3 %v1439_v10 }
 0x14d   :  { %564 = vmatpush.msra.mxu3 %v1446_v12 }
 0x14f   :  { %565 = vmatpush.msra.mxu3 %v1453_v14 }
 0x151   :  { %566 = vmatpush.msra.mxu3 %v1460_v16 }
 0x153   :  { %567 = vmatpush.msra.mxu3 %v1467_v18 }
 0x155   :  { %568 = vmatpush.msra.mxu3 %v1474_v20 }
 0x157   :  { %569 = vmatpush.msra.mxu3 %v1521_v27 }
 0x159   :  { %570 = vmatpush.msra.mxu3 %v1523_v28 }
 0x15b   :  { %571 = vmatpush.msra.mxu3 %v1527_v29 }
 0x15d   :  { %572 = vmatpush.msra.mxu3 %v1532_v30 }
 0x15f   :  { %573 = vmatpush.msra.mxu3 %v1537_v31 }
 0x161   :  { %574 = vmatpush.msra.mxu3 %v1546_v32 }
 0x163   :  { %575 = vmatpush.msra.mxu3 %v1550_v33 }
 0x165   :  { %576 = vmatpush.msra.mxu3 %v1558_v35 }
 0x1c9   :  { %v271_v63 = vpop.f32.mrf.mxu3 }
 0x1ca   :  { %v272_v3 = vadd.f32 %v271_v63, %v253_v62  ;;  %v785_v62 = vld [vmem:[#allocation11 + $0x58] sm:$0xff]  ;;  %v784_v63 = vld [vmem:[#allocation11 + $0x50] sm:$0xff] }
 0x1cc   :  { %274 = vst [vmem:[#allocation14] sm:$0x1] %v272_v3  ;;  %308 = vmatmul.f32.vlgmr.msrb.gmra.mxu0 %v272_v3  ;;  %v783_v3 = vld [vmem:[#allocation11 + $0x48] sm:$0xff] }
 0x1cd   :  { %599 = vmatpush.msrb.mxu0 %v1563_v37 }
 0x1cf   :  { %600 = vmatpush.msrb.mxu0 %v1565_v38 }
 0x1d1   :  { %601 = vmatpush.msrb.mxu0 %v1570_v40 }
 0x1d3   :  { %602 = vmatpush.msrb.mxu0 %v1575_v41 }
 0x1d5   :  { %603 = vmatpush.msrb.mxu0 %v1580_v42 }
 0x1d7   :  { %604 = vmatpush.msrb.mxu0 %v1585_v43 }
 0x1d9   :  { %605 = vmatpush.msrb.mxu0 %v1590_v44 }
 0x1db   :  { %606 = vmatpush.msrb.mxu0 %v1595_v45 }
 0x1dd   :  { %607 = vmatpush.msrb.mxu0 %v1600_v46 }
 0x1df   :  { %608 = vmatpush.msrb.mxu0 %v1605_v47 }
 0x1e1   :  { %609 = vmatpush.msrb.mxu0 %v1610_v48 }
 0x1e3   :  { %610 = vmatpush.msrb.mxu0 %v1615_v49 }
 0x1e5   :  { %611 = vmatpush.msrb.mxu0 %v1620_v50 }
 0x1e7   :  { %612 = vmatpush.msrb.mxu0 %v1629_v55 }
 0x1e9   :  { %613 = vmatpush.msrb.mxu0 %v1633_v56 }
 0x1eb   :  { %614 = vmatpush.msrb.mxu0 %v1638_v57 }
 0x249   :  { %v309_v26 = vpop.f32.mrf.mxu0 }
 0x24a   :  { %v312_v34 = vadd.f32 %v309_v26, %v275_v5  ;;  %v782_v5 = vld [vmem:[#allocation11 + $0x40] sm:$0xff]  ;;  %v781_v26 = vld [vmem:[#allocation11 + $0x38] sm:$0xff] }
 0x24c   :  { %v313_v36 = vmax.f32 %v312_v34, 0.0  ;;  %v780_v34 = vld [vmem:[#allocation11 + $0x30] sm:$0xff] }
 0x24e   :  { %347 = vmatmul.f32.vlgmr.msrb.gmra.mxu1 %v313_v36  ;;  %v779_v36 = vld [vmem:[#allocation11 + $0x28] sm:$0xff] }
 0x24f   :  { %637 = vmatpush.msrb.mxu1 %v1417_v0  ;;  %v330_v0 = vld [vmem:[%s1896_s6] sm:$0x1] }
 0x251   :  { %638 = vmatpush.msrb.mxu1 %v1419_v1 }
 0x253   :  { %639 = vmatpush.msrb.mxu1 %v1422_v2 }
 0x255   :  { %640 = vmatpush.msrb.mxu1 %v1425_v4 }
 0x257   :  { %641 = vmatpush.msrb.mxu1 %v1428_v6  ;;  %v368_v6 = vld [vmem:[%s1898_s8] sm:$0x1] }
 0x259   :  { %642 = vmatpush.msrb.mxu1 %v1437_v9  ;;  %v390_v9 = vld [vmem:[#allocation2 + $0x2] sm:$0x1] }
 0x25b   :  { %643 = vmatpush.msrb.mxu1 %v1444_v11 }
 0x25d   :  { %644 = vmatpush.msrb.mxu1 %v1451_v13  ;;  %v445_v13 = vld [vmem:[%s1896_s6] sm:$0x1] }
 0x25f   :  { %645 = vmatpush.msrb.mxu1 %v1458_v15 }
 0x261   :  { %646 = vmatpush.msrb.mxu1 %v1465_v17  ;;  %v483_v17 = vld [vmem:[%s1898_s8] sm:$0x1] }
 0x263   :  { %647 = vmatpush.msrb.mxu1 %v1472_v19 }
 0x265   :  { %648 = vmatpush.msrb.mxu1 %v1479_v21 }
 0x267   :  { %649 = vmatpush.msrb.mxu1 %v1484_v22 }
 0x269   :  { %650 = vmatpush.msrb.mxu1 %v1488_v23 }
 0x26b   :  { %651 = vmatpush.msrb.mxu1 %v1492_v24  ;;  %v560_v24 = vld [vmem:[%s1896_s6] sm:$0x1] }
 0x26d   :  { %652 = vmatpush.msrb.mxu1 %v1496_v25 }
 0x2cb   :  { %v348_v1 = vpop.f32.mrf.mxu1 }
 0x2cc   :  { %v349_v2 = vadd.f32 %v348_v1, %v330_v0  ;;  %v778_v0 = vld [vmem:[#allocation11 + $0x20] sm:$0xff]  ;;  %v777_v1 = vld [vmem:[#allocation11 + $0x18] sm:$0xff] }
 0x2ce   :  { %v351_v4 = vmax.f32 %v349_v2, 0.0  ;;  %v713_v2 = vld [vmem:[%s1898_s8] sm:$0x1] }
 0x2d0   :  { %385 = vmatmul.f32.vlgmr.msrb.gmra.mxu2 %v351_v4 }
 0x2d1   :  { %676 = vmatpush.msrb.mxu2 %v1430_v7 }
 0x2d3   :  { %677 = vmatpush.msrb.mxu2 %v1432_v8 }
 0x2d5   :  { %678 = vmatpush.msrb.mxu2 %v1439_v10 }
 0x2d7   :  { %679 = vmatpush.msrb.mxu2 %v1446_v12 }
 0x2d9   :  { %680 = vmatpush.msrb.mxu2 %v1453_v14 }
 0x2db   :  { %681 = vmatpush.msrb.mxu2 %v1460_v16 }
 0x2dd   :  { %682 = vmatpush.msrb.mxu2 %v1467_v18 }
 0x2df   :  { %683 = vmatpush.msrb.mxu2 %v1474_v20  ;;  %v505_v20 = vld [vmem:[#allocation2 + $0x3] sm:$0x1] }
 0x2e1   :  { %684 = vmatpush.msrb.mxu2 %v1521_v27 }
 0x2e3   :  { %685 = vmatpush.msrb.mxu2 %v1523_v28 }
 0x2e5   :  { %686 = vmatpush.msrb.mxu2 %v1527_v29  ;;  %v598_v29 = vld [vmem:[%s1898_s8] sm:$0x1] }
 0x2e7   :  { %687 = vmatpush.msrb.mxu2 %v1532_v30 }
 0x2e9   :  { %688 = vmatpush.msrb.mxu2 %v1537_v31 }
 0x2eb   :  { %689 = vmatpush.msrb.mxu2 %v1546_v32  ;;  %v620_v32 = vld [vmem:[#allocation2 + $0x4] sm:$0x1] }
 0x2ed   :  { %690 = vmatpush.msrb.mxu2 %v1550_v33 }
 0x2ef   :  { %691 = vmatpush.msrb.mxu2 %v1558_v35 }
 0x353   :  { %v386_v7 = vpop.f32.mrf.mxu2 }
 0x354   :  { %v387_v8 = vadd.f32 %v386_v7, %v368_v6  ;;  %v776_v7 = vld [vmem:[#allocation11 + $0x10] sm:$0xff] }
 0x356   :  { %389 = vst [vmem:[#allocation14 + $0x1] sm:$0x1] %v387_v8  ;;  %423 = vmatmul.f32.vlgmr.msrb.gmra.mxu3 %v387_v8  ;;  %v775_v8 = vld [vmem:[#allocation11 + $0x8] sm:$0xff] }
 0x357   :  { %714 = vmatpush.msrb.mxu3 %v1563_v37 }
 0x359   :  { %715 = vmatpush.msrb.mxu3 %v1565_v38  ;;  %v1780_v38 = vld [vmem:[#allocation9 + $0x78] sm:$0xff] }
 0x35b   :  { %716 = vmatpush.msrb.mxu3 %v1570_v40  ;;  %v1786_v40 = vld [vmem:[#allocation9 + $0x68] sm:$0xff] }
 0x35d   :  { %717 = vmatpush.msrb.mxu3 %v1575_v41  ;;  %v1790_v41 = vld [vmem:[#allocation9 + $0x60] sm:$0xff] }
 0x35f   :  { %718 = vmatpush.msrb.mxu3 %v1580_v42  ;;  %v1794_v42 = vld [vmem:[#allocation9 + $0x58] sm:$0xff] }
 0x361   :  { %719 = vmatpush.msrb.mxu3 %v1585_v43  ;;  %v1798_v43 = vld [vmem:[#allocation9 + $0x50] sm:$0xff] }
 0x363   :  { %720 = vmatpush.msrb.mxu3 %v1590_v44  ;;  %v1802_v44 = vld [vmem:[#allocation9 + $0x48] sm:$0xff] }
 0x365   :  { %721 = vmatpush.msrb.mxu3 %v1595_v45  ;;  %v1806_v45 = vld [vmem:[#allocation9 + $0x40] sm:$0xff] }
 0x367   :  { %722 = vmatpush.msrb.mxu3 %v1600_v46  ;;  %v1810_v46 = vld [vmem:[#allocation9 + $0x38] sm:$0xff] }
 0x369   :  { %723 = vmatpush.msrb.mxu3 %v1605_v47  ;;  %v1814_v47 = vld [vmem:[#allocation9 + $0x30] sm:$0xff] }
 0x36b   :  { %724 = vmatpush.msrb.mxu3 %v1610_v48  ;;  %v1818_v48 = vld [vmem:[#allocation9 + $0x28] sm:$0xff] }
 0x36d   :  { %725 = vmatpush.msrb.mxu3 %v1615_v49  ;;  %v1822_v49 = vld [vmem:[#allocation9 + $0x20] sm:$0xff] }
 0x36f   :  { %726 = vmatpush.msrb.mxu3 %v1620_v50  ;;  %v1826_v50 = vld [vmem:[#allocation9 + $0x18] sm:$0xff] }
 0x371   :  { %727 = vmatpush.msrb.mxu3 %v1629_v55 }
 0x373   :  { %728 = vmatpush.msrb.mxu3 %v1633_v56  ;;  %v1839_v56 = vld [vmem:[#allocation9 + $0x8] sm:$0xff] }
 0x375   :  { %729 = vmatpush.msrb.mxu3 %v1638_v57  ;;  %v1843_v57 = vld [vmem:[#allocation9] sm:$0xff] }
 0x3d9   :  { %v424_v10 = vpop.f32.mrf.mxu3 }
 0x3da   :  { %v427_v11 = vadd.f32 %v424_v10, %v390_v9  ;;  %v774_v9 = vld [vmem:[#allocation11] sm:$0xff]  ;;  %v827_v10 = vld [vmem:[#allocation12 + $0x78] sm:$0xff] }
 0x3dc   :  { %v428_v12 = vmax.f32 %v427_v11, 0.0  ;;  %v826_v11 = vld [vmem:[#allocation12 + $0x70] sm:$0xff] }
 0x3de   :  { %462 = vmatmul.f32.vlgmr.msra.gmra.mxu0 %v428_v12  ;;  %v825_v12 = vld [vmem:[#allocation12 + $0x68] sm:$0xff] }
 0x3df   :  { %752 = vmatpush.msra.mxu0 %v1780_v38 }
 0x3e1   :  { %753 = vmatpush.msra.mxu0 %v1782_v39 }
 0x3e3   :  { %754 = vmatpush.msra.mxu0 %v1786_v40 }
 0x3e5   :  { %755 = vmatpush.msra.mxu0 %v1790_v41 }
 0x3e7   :  { %756 = vmatpush.msra.mxu0 %v1794_v42 }
 0x3e9   :  { %757 = vmatpush.msra.mxu0 %v1798_v43 }
 0x3eb   :  { %758 = vmatpush.msra.mxu0 %v1802_v44 }
 0x3ed   :  { %759 = vmatpush.msra.mxu0 %v1806_v45 }
 0x3ef   :  { %760 = vmatpush.msra.mxu0 %v1810_v46 }
 0x3f1   :  { %761 = vmatpush.msra.mxu0 %v1814_v47 }
 0x3f3   :  { %762 = vmatpush.msra.mxu0 %v1818_v48 }
 0x3f5   :  { %763 = vmatpush.msra.mxu0 %v1822_v49 }
 0x3f7   :  { %764 = vmatpush.msra.mxu0 %v1826_v50 }
 0x3f9   :  { %765 = vmatpush.msra.mxu0 %v1830_v51 }
 0x3fb   :  { %766 = vmatpush.msra.mxu0 %v1839_v56 }
 0x3fd   :  { %767 = vmatpush.msra.mxu0 %v1843_v57 }
 0x45b   :  { %v463_v14 = vpop.f32.mrf.mxu0 }
 0x45c   :  { %v464_v15 = vadd.f32 %v463_v14, %v445_v13  ;;  %v824_v13 = vld [vmem:[#allocation12 + $0x60] sm:$0xff]  ;;  %v823_v14 = vld [vmem:[#allocation12 + $0x58] sm:$0xff] }
 0x45e   :  { %v466_v16 = vmax.f32 %v464_v15, 0.0  ;;  %v822_v15 = vld [vmem:[#allocation12 + $0x50] sm:$0xff] }
 0x460   :  { %500 = vmatmul.f32.vlgmr.msra.gmra.mxu1 %v466_v16  ;;  %v821_v16 = vld [vmem:[#allocation12 + $0x48] sm:$0xff] }
 0x461   :  { %791 = vmatpush.msra.mxu1 %v789_v58 }
 0x463   :  { %792 = vmatpush.msra.mxu1 %v788_v59 }
 0x465   :  { %793 = vmatpush.msra.mxu1 %v787_v60 }
 0x467   :  { %794 = vmatpush.msra.mxu1 %v786_v61 }
 0x469   :  { %795 = vmatpush.msra.mxu1 %v785_v62 }
 0x46b   :  { %796 = vmatpush.msra.mxu1 %v784_v63 }
 0x46d   :  { %797 = vmatpush.msra.mxu1 %v783_v3 }
 0x46f   :  { %798 = vmatpush.msra.mxu1 %v782_v5 }
 0x471   :  { %799 = vmatpush.msra.mxu1 %v781_v26 }
 0x473   :  { %800 = vmatpush.msra.mxu1 %v780_v34 }
 0x475   :  { %801 = vmatpush.msra.mxu1 %v779_v36 }
 0x477   :  { %802 = vmatpush.msra.mxu1 %v778_v0 }
 0x479   :  { %803 = vmatpush.msra.mxu1 %v777_v1 }
 0x47b   :  { %804 = vmatpush.msra.mxu1 %v776_v7 }
 0x47d   :  { %805 = vmatpush.msra.mxu1 %v775_v8 }
 0x47f   :  { %806 = vmatpush.msra.mxu1 %v774_v9 }
 0x4dd   :  { %v501_v18 = vpop.f32.mrf.mxu1 }
 0x4de   :  { %v502_v19 = vadd.f32 %v501_v18, %v483_v17  ;;  %v820_v17 = vld [vmem:[#allocation12 + $0x40] sm:$0xff]  ;;  %v819_v18 = vld [vmem:[#allocation12 + $0x38] sm:$0xff] }
 0x4e0   :  { %504 = vst [vmem:[#allocation14 + $0x2] sm:$0x1] %v502_v19  ;;  %538 = vmatmul.f32.vlgmr.msra.gmra.mxu2 %v502_v19  ;;  %v818_v19 = vld [vmem:[#allocation12 + $0x30] sm:$0xff] }
 0x4e1   :  { %829 = vmatpush.msra.mxu2 %v827_v10 }
 0x4e3   :  { %830 = vmatpush.msra.mxu2 %v826_v11 }
 0x4e5   :  { %831 = vmatpush.msra.mxu2 %v825_v12 }
 0x4e7   :  { %832 = vmatpush.msra.mxu2 %v824_v13 }
 0x4e9   :  { %833 = vmatpush.msra.mxu2 %v823_v14 }
 0x4eb   :  { %834 = vmatpush.msra.mxu2 %v822_v15 }
 0x4ed   :  { %835 = vmatpush.msra.mxu2 %v821_v16 }
 0x4ef   :  { %836 = vmatpush.msra.mxu2 %v820_v17 }
 0x4f1   :  { %837 = vmatpush.msra.mxu2 %v819_v18 }
 0x4f3   :  { %838 = vmatpush.msra.mxu2 %v818_v19 }
 0x563   :  { %v539_v21 = vpop.f32.mrf.mxu2 }
 0x564   :  { %v542_v22 = vadd.f32 %v539_v21, %v505_v20  ;;  %v817_v20 = vld [vmem:[#allocation12 + $0x28] sm:$0xff]  ;;  %v816_v21 = vld [vmem:[#allocation12 + $0x20] sm:$0xff] }
 0x565   :  { %839 = vmatpush.msra.mxu2 %v817_v20 }
 0x566   :  { %v543_v23 = vmax.f32 %v542_v22, 0.0  ;;  %v815_v22 = vld [vmem:[#allocation12 + $0x18] sm:$0xff] }
 0x567   :  { %840 = vmatpush.msra.mxu2 %v816_v21 }
 0x568   :  { %577 = vmatmul.f32.vlgmr.msra.gmra.mxu3 %v543_v23  ;;  %v735_v23 = vld [vmem:[#allocation2 + $0x5] sm:$0x1] }
 0x569   :  { %867 = vmatpush.msra.mxu3 %v1780_v38  ;;  %841 = vmatpush.msra.mxu2 %v815_v22 }
 0x56b   :  { %868 = vmatpush.msra.mxu3 %v1782_v39 }
 0x56d   :  { %869 = vmatpush.msra.mxu3 %v1786_v40 }
 0x56f   :  { %870 = vmatpush.msra.mxu3 %v1790_v41 }
 0x571   :  { %871 = vmatpush.msra.mxu3 %v1794_v42 }
 0x573   :  { %872 = vmatpush.msra.mxu3 %v1798_v43 }
 0x575   :  { %873 = vmatpush.msra.mxu3 %v1802_v44 }
 0x577   :  { %874 = vmatpush.msra.mxu3 %v1806_v45 }
 0x579   :  { %875 = vmatpush.msra.mxu3 %v1810_v46 }
 0x57b   :  { %876 = vmatpush.msra.mxu3 %v1814_v47 }
 0x57d   :  { %877 = vmatpush.msra.mxu3 %v1818_v48 }
 0x57f   :  { %878 = vmatpush.msra.mxu3 %v1822_v49 }
 0x581   :  { %879 = vmatpush.msra.mxu3 %v1826_v50 }
 0x583   :  { %880 = vmatpush.msra.mxu3 %v1830_v51 }
 0x585   :  { %881 = vmatpush.msra.mxu3 %v1839_v56 }
 0x587   :  { %882 = vmatpush.msra.mxu3 %v1843_v57 }
 0x5eb   :  { %v578_v25 = vpop.f32.mrf.mxu3 }
 0x5ec   :  { %v579_v27 = vadd.f32 %v578_v25, %v560_v24 }
 0x5ee   :  { %v581_v28 = vmax.f32 %v579_v27, 0.0 }
 0x5f0   :  { %615 = vmatmul.f32.vlgmr.msrb.gmra.mxu0 %v581_v28  ;;  %v814_v28 = vld [vmem:[#allocation12 + $0x10] sm:$0xff] }
 0x5f1   :  { %906 = vmatpush.msrb.mxu0 %v789_v58  ;;  %842 = vmatpush.msra.mxu2 %v814_v28 }
 0x5f3   :  { %907 = vmatpush.msrb.mxu0 %v788_v59 }
 0x5f5   :  { %908 = vmatpush.msrb.mxu0 %v787_v60 }
 0x5f7   :  { %909 = vmatpush.msrb.mxu0 %v786_v61 }
 0x5f9   :  { %910 = vmatpush.msrb.mxu0 %v785_v62 }
 0x5fb   :  { %911 = vmatpush.msrb.mxu0 %v784_v63 }
 0x5fd   :  { %912 = vmatpush.msrb.mxu0 %v783_v3 }
 0x5ff   :  { %913 = vmatpush.msrb.mxu0 %v782_v5 }
 0x601   :  { %914 = vmatpush.msrb.mxu0 %v781_v26 }
 0x603   :  { %915 = vmatpush.msrb.mxu0 %v780_v34 }
 0x605   :  { %916 = vmatpush.msrb.mxu0 %v779_v36 }
 0x607   :  { %917 = vmatpush.msrb.mxu0 %v778_v0 }
 0x609   :  { %918 = vmatpush.msrb.mxu0 %v777_v1 }
 0x60b   :  { %919 = vmatpush.msrb.mxu0 %v776_v7 }
 0x60d   :  { %920 = vmatpush.msrb.mxu0 %v775_v8 }
 0x60f   :  { %921 = vmatpush.msrb.mxu0 %v774_v9 }
 0x66d   :  { %v616_v30 = vpop.f32.mrf.mxu0 }
 0x66e   :  { %v617_v31 = vadd.f32 %v616_v30, %v598_v29  ;;  %v813_v29 = vld [vmem:[#allocation12 + $0x8] sm:$0xff]  ;;  %v812_v30 = vld [vmem:[#allocation12] sm:$0xff] }
 0x66f   :  { %843 = vmatpush.msra.mxu2 %v813_v29 }
 0x670   :  { %619 = vst [vmem:[#allocation14 + $0x3] sm:$0x1] %v617_v31  ;;  %653 = vmatmul.f32.vlgmr.msrb.gmra.mxu1 %v617_v31  ;;  %v790_v31 = vld [vmem:[%s1896_s6] sm:$0x1] }
 0x671   :  { %944 = vmatpush.msrb.mxu1 %v827_v10  ;;  %844 = vmatpush.msra.mxu2 %v812_v30 }
 0x673   :  { %945 = vmatpush.msrb.mxu1 %v826_v11 }
 0x675   :  { %946 = vmatpush.msrb.mxu1 %v825_v12 }
 0x677   :  { %947 = vmatpush.msrb.mxu1 %v824_v13 }
 0x679   :  { %948 = vmatpush.msrb.mxu1 %v823_v14 }
 0x67b   :  { %949 = vmatpush.msrb.mxu1 %v822_v15 }
 0x67d   :  { %950 = vmatpush.msrb.mxu1 %v821_v16 }
 0x67f   :  { %951 = vmatpush.msrb.mxu1 %v820_v17 }
 0x681   :  { %952 = vmatpush.msrb.mxu1 %v819_v18 }
 0x683   :  { %953 = vmatpush.msrb.mxu1 %v818_v19 }
 0x685   :  { %954 = vmatpush.msrb.mxu1 %v817_v20 }
 0x687   :  { %955 = vmatpush.msrb.mxu1 %v816_v21 }
 0x689   :  { %956 = vmatpush.msrb.mxu1 %v815_v22 }
 0x68b   :  { %957 = vmatpush.msrb.mxu1 %v814_v28 }
 0x68d   :  { %958 = vmatpush.msrb.mxu1 %v813_v29 }
 0x68f   :  { %959 = vmatpush.msrb.mxu1 %v812_v30 }
 0x6ed   :  { %v654_v33 = vpop.f32.mrf.mxu1 }
 0x6ee   :  { %v657_v35 = vadd.f32 %v654_v33, %v620_v32 }
 0x6f0   :  { %v658_v37 = vmax.f32 %v657_v35, 0.0 }
 0x6f2   :  { %692 = vmatmul.f32.vlgmr.msrb.gmra.mxu2 %v658_v37  ;;  %v828_v37 = vld [vmem:[%s1898_s8] sm:$0x1] }
 0x6f3   :  { %982 = vmatpush.msrb.mxu2 %v1780_v38 }
 0x6f5   :  { %983 = vmatpush.msrb.mxu2 %v1782_v39 }
 0x6f7   :  { %984 = vmatpush.msrb.mxu2 %v1786_v40  ;;  %v850_v40 = vld [vmem:[#allocation2 + $0x6] sm:$0x1] }
 0x6f9   :  { %985 = vmatpush.msrb.mxu2 %v1790_v41 }
 0x6fb   :  { %986 = vmatpush.msrb.mxu2 %v1794_v42 }
 0x6fd   :  { %987 = vmatpush.msrb.mxu2 %v1798_v43 }
 0x6ff   :  { %988 = vmatpush.msrb.mxu2 %v1802_v44  ;;  %v905_v44 = vld [vmem:[%s1896_s6] sm:$0x1] }
 0x701   :  { %989 = vmatpush.msrb.mxu2 %v1806_v45 }
 0x703   :  { %990 = vmatpush.msrb.mxu2 %v1810_v46 }
 0x705   :  { %991 = vmatpush.msrb.mxu2 %v1814_v47 }
 0x707   :  { %992 = vmatpush.msrb.mxu2 %v1818_v48  ;;  %v943_v48 = vld [vmem:[%s1898_s8] sm:$0x1] }
 0x709   :  { %993 = vmatpush.msrb.mxu2 %v1822_v49 }
 0x70b   :  { %994 = vmatpush.msrb.mxu2 %v1826_v50 }
 0x70d   :  { %995 = vmatpush.msrb.mxu2 %v1830_v51  ;;  %v965_v51 = vld [vmem:[#allocation2 + $0x7] sm:$0x1] }
 0x70f   :  { %996 = vmatpush.msrb.mxu2 %v1839_v56 }
 0x711   :  { %997 = vmatpush.msrb.mxu2 %v1843_v57 }
 0x775   :  { %v693_v53 = vpop.f32.mrf.mxu2 }
 0x776   :  { %v694_v54 = vadd.f32 %v693_v53, %v675_v52 }
 0x778   :  { %v696_v55 = vmax.f32 %v694_v54, 0.0 }
 0x77a   :  { %730 = vmatmul.f32.vlgmr.msrb.gmra.mxu3 %v696_v55  ;;  %v1020_v55 = vld [vmem:[%s1896_s6] sm:$0x1]  ;;  %s1099_s6 = sshll.u32 %s1900_s10, 4  ;;  %s1100_s6 = int_to_ptr.hbm [resolvable:$true] %s1099_s6 }
 0x77b   :  { %1021 = vmatpush.msrb.mxu3 %v789_v58 }
 0x77d   :  { %1022 = vmatpush.msrb.mxu3 %v788_v59  ;;  %v1058_v59 = vld [vmem:[%s1898_s8] sm:$0x1] }
 0x77f   :  { %1023 = vmatpush.msrb.mxu3 %v787_v60 }
 0x781   :  { %1024 = vmatpush.msrb.mxu3 %v786_v61 }
 0x783   :  { %1025 = vmatpush.msrb.mxu3 %v785_v62 }
 0x785   :  { %1026 = vmatpush.msrb.mxu3 %v784_v63 }
 0x787   :  { %1027 = vmatpush.msrb.mxu3 %v783_v3 }
 0x789   :  { %1028 = vmatpush.msrb.mxu3 %v782_v5 }
 0x78b   :  { %1029 = vmatpush.msrb.mxu3 %v781_v26 }
 0x78d   :  { %1030 = vmatpush.msrb.mxu3 %v780_v34 }
 0x78f   :  { %1031 = vmatpush.msrb.mxu3 %v779_v36 }
 0x791   :  { %1032 = vmatpush.msrb.mxu3 %v778_v0 }
 0x793   :  { %1033 = vmatpush.msrb.mxu3 %v777_v1 }
 0x795   :  { %1034 = vmatpush.msrb.mxu3 %v776_v7 }
 0x797   :  { %1035 = vmatpush.msrb.mxu3 %v775_v8 }
 0x799   :  { %1036 = vmatpush.msrb.mxu3 %v774_v9 }
 0x7fd   :  { %v731_v4 = vpop.f32.mrf.mxu3 }
 0x7fe   :  { %v732_v6 = vadd.f32 %v731_v4, %v713_v2 }
 0x800   :  { %734 = vst [vmem:[#allocation14 + $0x4] sm:$0x1] %v732_v6  ;;  %768 = vmatmul.f32.vlgmr.msra.gmra.mxu0 %v732_v6 }
 0x801   :  { %1059 = vmatpush.msra.mxu0 %v827_v10 }
 0x803   :  { %1060 = vmatpush.msra.mxu0 %v826_v11 }
 0x805   :  { %1061 = vmatpush.msra.mxu0 %v825_v12 }
 0x807   :  { %1062 = vmatpush.msra.mxu0 %v824_v13 }
 0x809   :  { %1063 = vmatpush.msra.mxu0 %v823_v14 }
 0x80b   :  { %1064 = vmatpush.msra.mxu0 %v822_v15 }
 0x80d   :  { %1065 = vmatpush.msra.mxu0 %v821_v16 }
 0x80f   :  { %1066 = vmatpush.msra.mxu0 %v820_v17 }
 0x811   :  { %1067 = vmatpush.msra.mxu0 %v819_v18 }
 0x813   :  { %1068 = vmatpush.msra.mxu0 %v818_v19 }
 0x815   :  { %1069 = vmatpush.msra.mxu0 %v817_v20 }
 0x817   :  { %1070 = vmatpush.msra.mxu0 %v816_v21 }
 0x819   :  { %1071 = vmatpush.msra.mxu0 %v815_v22 }
 0x81b   :  { %1072 = vmatpush.msra.mxu0 %v814_v28 }
 0x81d   :  { %1073 = vmatpush.msra.mxu0 %v813_v29 }
 0x81f   :  { %1074 = vmatpush.msra.mxu0 %v812_v30 }
 0x87d   :  { %v769_v24 = vpop.f32.mrf.mxu0 }
 0x87e   :  { %v772_v25 = vadd.f32 %v769_v24, %v735_v23 }
 0x880   :  { %v773_v27 = vmax.f32 %v772_v25, 0.0 }
 0x882   :  { %807 = vmatmul.f32.vlgmr.msra.gmra.mxu1 %v773_v27 }
 0x8ff   :  { %v808_v32 = vpop.f32.mrf.mxu1 }
 0x900   :  { %v809_v33 = vadd.f32 %v808_v32, %v790_v31 }
 0x902   :  { %v811_v35 = vmax.f32 %v809_v33, 0.0 }
 0x904   :  { %845 = vmatmul.f32.vlgmr.msra.gmra.mxu2 %v811_v35 }
 0x987   :  { %v846_v38 = vpop.f32.mrf.mxu2 }
 0x988   :  { %v847_v39 = vadd.f32 %v846_v38, %v828_v37 }
 0x98a   :  { %849 = vst [vmem:[#allocation14 + $0x5] sm:$0x1] %v847_v39  ;;  %883 = vmatmul.f32.vlgmr.msra.gmra.mxu3 %v847_v39 }
 0xa0d   :  { %v884_v41 = vpop.f32.mrf.mxu3 }
 0xa0e   :  { %v887_v42 = vadd.f32 %v884_v41, %v850_v40 }
 0xa10   :  { %v888_v43 = vmax.f32 %v887_v42, 0.0 }
 0xa12   :  { %922 = vmatmul.f32.vlgmr.msrb.gmra.mxu0 %v888_v43 }
 0xa8f   :  { %v923_v45 = vpop.f32.mrf.mxu0 }
 0xa90   :  { %v924_v46 = vadd.f32 %v923_v45, %v905_v44 }
 0xa92   :  { %v926_v47 = vmax.f32 %v924_v46, 0.0 }
 0xa94   :  { %960 = vmatmul.f32.vlgmr.msrb.gmra.mxu1 %v926_v47 }
 0xb11   :  { %v961_v49 = vpop.f32.mrf.mxu1 }
 0xb12   :  { %v962_v50 = vadd.f32 %v961_v49, %v943_v48 }
 0xb14   :  { %964 = vst [vmem:[#allocation14 + $0x6] sm:$0x1] %v962_v50  ;;  %998 = vmatmul.f32.vlgmr.msrb.gmra.mxu2 %v962_v50 }
 0xb97   :  { %v999_v52 = vpop.f32.mrf.mxu2 }
 0xb98   :  { %v1002_v53 = vadd.f32 %v999_v52, %v965_v51 }
 0xb9a   :  { %v1003_v54 = vmax.f32 %v1002_v53, 0.0 }
 0xb9c   :  { %1037 = vmatmul.f32.vlgmr.msrb.gmra.mxu3 %v1003_v54 }
 0xc1f   :  { %v1038_v56 = vpop.f32.mrf.mxu3 }
 0xc20   :  { %v1039_v57 = vadd.f32 %v1038_v56, %v1020_v55 }
 0xc22   :  { %v1041_v58 = vmax.f32 %v1039_v57, 0.0 }
 0xc24   :  { %1075 = vmatmul.f32.vlgmr.msra.gmra.mxu0 %v1041_v58 }
 0xca1   :  { %v1076_v60 = vpop.f32.mrf.mxu0 }
 0xca2   :  { %v1077_v61 = vadd.f32 %v1076_v60, %v1058_v59 }
 0xca4   :  { %1079 = vst [vmem:[#allocation14 + $0x7] sm:$0x1] %v1077_v61 }
 0xca5   :  { %1080 = vst [vmem:[#allocation15] sm:$0x1] %v1077_v61  ;;  %1091 = dma.vmem_to_hbm [thread:$0]  %s1087_s26, 128, %s1089_s28, [#allocation5]  }
 0xca6   :  { %1102 = dma.vmem_to_hbm [thread:$0]  %s1098_s30, 16, %s1100_s6, [#allocation16]  }
 0xca7   :  { %1330 = dma.done.wait [#allocation5], 128  }
 0xca8   :  { %1331 = vsyncadd [#allocation5], 4294967168 }
 0xca9   :  { %1332 = dma.done.wait [#allocation16], 16  }
 0xcaa   :  { %1333 = vsyncadd [#allocation16], 4294967280 }
 0xcab   :  { %1111 = vsyncpa [#allocation4], 1 }
 0xcac   :  { %1112 = vsyncpa [#allocation7], 1 }
 0xcad   :  { %1113 = vsyncpa [#allocation10], 1 }
 0xcae   :  { %1114 = vsyncpa [#allocation13], 1 }
 0xcaf   :  { %1115 = vsyncpa [#allocation5], 1 }
 0xcb0   :  { %1116 = vsyncpa [#allocation16], 1 }

</bundles_post_ra>
